<compile_context>
chip_gen: v7x
topology: tpu7x:2x2x1
jax: 0.10.0
libtpu: 0.0.40
codegen_flags: <defaults>
</compile_context>

<pallas_src>
import functools

import jax
import jax.numpy as jnp
from jax.experimental import pallas as pl
from jax.experimental.pallas import tpu as pltpu


def _ngram_lm_kernel(idx_ref, ew1_ref, b1_ref, w2_ref, b2_ref, out_ref, *, context):
    """One batch tile of the full NgramLanguageModel forward.

    idx_ref : (Bt, C)     int32   token indices, pre-offset by c*V per slot
    ew1_ref : (C*V, H)    bfloat16  stacked (emb @ W1_slot) matrices
    b1_ref  : (1, H)      float32
    w2_ref  : (H, V)      bfloat16
    b2_ref  : (1, V)      float32
    out_ref : (Bt, V)     float32 log-probabilities
    """
    idx = idx_ref[...]                        # (Bt, C), already offset by c*V
    bt = idx.shape[0]
    cv = ew1_ref.shape[0]                     # C * V

    # Stacked multi-hot (Bt, C*V): column c*V + token[b, c] is 1.
    # Single hoisted iota, C cheap VPU compares OR'd together (offsets disjoint).
    lane_iota = jax.lax.broadcasted_iota(jnp.int32, (bt, cv), 1)
    hot = lane_iota == idx[:, 0:1]
    for c in range(1, context):               # static, small (ngram-1)
        hot = hot | (lane_iota == idx[:, c:c + 1])
    onehot = hot.astype(jnp.float32).astype(jnp.bfloat16)   # (Bt, C*V)

    # Fused embedding-lookup + linear1: one MXU matmul, f32 accumulation.
    h = jnp.dot(onehot, ew1_ref[...], preferred_element_type=jnp.float32)
    h = h + b1_ref[...]                       # (Bt, H)
    h = jnp.maximum(h, 0.0)                   # ReLU (f32)

    # linear2 (bf16 operands, f32 accumulation) + bias.
    logits = jnp.dot(h.astype(jnp.bfloat16), w2_ref[...],
                     preferred_element_type=jnp.float32) + b2_ref[...]

    # Numerically stable log_softmax over vocab axis.
    m = jnp.max(logits, axis=-1, keepdims=True)
    shifted = logits - m
    lse = jnp.log(jnp.sum(jnp.exp(shifted), axis=-1, keepdims=True))
    out_ref[...] = shifted - lse


def ngram_lm_forward(inputs, params, *, ngram, batch_tile=128):
    """inputs: (B, ngram-1) int32 tokens; returns (B, vocab) float32 log-probs."""
    emb, w1, b1, w2, b2 = params
    B, C = inputs.shape
    V, D = emb.shape
    H = w1.shape[1]
    assert C == ngram - 1

    # Constant-fold the embedding table into linear1:
    #   sum_c emb[idx[:,c]] @ W1[c*D:(c+1)*D]  ==  multihot @ (emb @ W1_slices)
    ew1 = jnp.einsum("vd,cdh->cvh", emb, w1.reshape(C, D, H))
    ew1 = ew1.reshape(C * V, H).astype(jnp.bfloat16)         # (C*V, H) bf16
    w2_b = w2.astype(jnp.bfloat16)                           # (H, V)  bf16

    # Offset tokens so a single stacked multi-hot covers every context slot.
    idx_off = (inputs.astype(jnp.int32)
               + (jnp.arange(C, dtype=jnp.int32) * V)[None, :])

    # Batch tiling (pad to a multiple of the tile, slice result back).
    bt = batch_tile
    n_tiles = pl.cdiv(B, bt)
    b_pad = n_tiles * bt
    if b_pad != B:
        idx_off = jnp.pad(idx_off, ((0, b_pad - B), (0, 0)))

    kernel = functools.partial(_ngram_lm_kernel, context=C)

    out = pl.pallas_call(
        kernel,
        out_shape=jax.ShapeDtypeStruct((b_pad, V), jnp.float32),
        grid=(n_tiles,),
        in_specs=[
            pl.BlockSpec((bt, C), lambda i: (i, 0)),       # token indices per tile
            pl.BlockSpec((C * V, H), lambda i: (0, 0)),    # ew1: VMEM-resident
            pl.BlockSpec((1, H), lambda i: (0, 0)),        # b1
            pl.BlockSpec((H, V), lambda i: (0, 0)),        # w2
            pl.BlockSpec((1, V), lambda i: (0, 0)),        # b2
        ],
        out_specs=pl.BlockSpec((bt, V), lambda i: (i, 0)),
        compiler_params=pltpu.CompilerParams(
            dimension_semantics=("parallel",)),
    )(idx_off, ew1, b1, w2_b, b2)

    return out[:B]


def init_params(key, vocab_size, embedding_dim, ngram, hidden=128):
    """Deterministic parameter init (shapes match the torch module; weights are
    stored as [in_features, out_features], i.e. transposed vs nn.Linear.weight)."""
    context = ngram - 1
    k_emb, k_w1, k_b1, k_w2, k_b2 = jax.random.split(key, 5)
    emb = jax.random.normal(k_emb, (vocab_size, embedding_dim), jnp.float32)
    w1 = 0.05 * jax.random.normal(k_w1, (context * embedding_dim, hidden), jnp.float32)
    b1 = 0.05 * jax.random.normal(k_b1, (1, hidden), jnp.float32)
    w2 = 0.05 * jax.random.normal(k_w2, (hidden, vocab_size), jnp.float32)
    b2 = 0.05 * jax.random.normal(k_b2, (1, vocab_size), jnp.float32)
    return emb, w1, b1, w2, b2


def ngram_lm_reference(inputs, params):
    """Pure-JAX f32 reference of the same forward (correctness check)."""
    emb, w1, b1, w2, b2 = params
    B = inputs.shape[0]
    x = jnp.take(emb, inputs, axis=0).reshape(B, -1)   # embed + concat (view)
    h = jnp.maximum(x @ w1 + b1, 0.0)
    logits = h @ w2 + b2
    return jax.nn.log_softmax(logits, axis=1)


if __name__ == "__main__":
    vocab_size = 128
    embedding_dim = 32
    ngram = 5
    hidden = 128
    batch = 200   # deliberately not a multiple of the 128-row batch tile

    key = jax.random.PRNGKey(0)
    k_params, k_inputs = jax.random.split(key)
    params = init_params(k_params, vocab_size, embedding_dim, ngram, hidden)
    inputs = jax.random.randint(
        k_inputs, (batch, ngram - 1), 0, vocab_size, dtype=jnp.int32)

    out = ngram_lm_forward(inputs, params, ngram=ngram)
    out = jax.block_until_ready(out)

    ref = ngram_lm_reference(inputs, params)
    assert out.shape == (batch, vocab_size)
    max_err = float(jnp.max(jnp.abs(out - ref)))
    assert max_err < 5e-2, f"mismatch vs reference: max abs err {max_err}"

    print("KERNEL_OK")
</pallas_src>

<mosaic_0001>
module attributes {stable_mosaic.version = 11 : i64} {
  func.func @_ngram_lm_kernel(%arg0: i32, %arg1: memref<128x4xi32, #tpu.memory_space<vmem>>, %arg2: memref<512x128xbf16, #tpu.memory_space<vmem>>, %arg3: memref<1x128xf32, #tpu.memory_space<vmem>>, %arg4: memref<128x128xbf16, #tpu.memory_space<vmem>>, %arg5: memref<1x128xf32, #tpu.memory_space<vmem>>, %arg6: memref<128x128xf32, #tpu.memory_space<vmem>>) attributes {dimension_semantics = [#tpu.dimension_semantics<parallel>], iteration_bounds = array<i64: 2>, scalar_prefetch = 0 : i64, scratch_operands = 0 : i64, tpu.core_type = #tpu.core_type<tc>, window_params = [{transform_indices = @transform_0, window_bounds = array<i64: 128, 4>}, {pipeline_mode = #tpu.pipeline_mode<synchronous>, transform_indices = @transform_1, window_bounds = array<i64: 512, 128>}, {pipeline_mode = #tpu.pipeline_mode<synchronous>, transform_indices = @transform_2, window_bounds = array<i64: 1, 128>}, {pipeline_mode = #tpu.pipeline_mode<synchronous>, transform_indices = @transform_3, window_bounds = array<i64: 128, 128>}, {pipeline_mode = #tpu.pipeline_mode<synchronous>, transform_indices = @transform_4, window_bounds = array<i64: 1, 128>}, {transform_indices = @transform_5, window_bounds = array<i64: 128, 128>}]} {
    %c0 = arith.constant 0 : index
    %c0_0 = arith.constant 0 : index
    %0 = vector.load %arg1[%c0, %c0_0] : memref<128x4xi32, #tpu.memory_space<vmem>>, vector<128x4xi32>
    %1 = tpu.iota {dimensions = array<i32: 1>} : vector<128x512xi32>
    %2 = vector.extract_strided_slice %0 {offsets = [0, 0], sizes = [128, 1], strides = [1, 1]} : vector<128x4xi32> to vector<128x1xi32>
    %3 = vector.broadcast %2 : vector<128x1xi32> to vector<128x512xi32>
    %4 = arith.cmpi eq, %1, %3 : vector<128x512xi32>
    %5 = vector.extract_strided_slice %0 {offsets = [0, 1], sizes = [128, 1], strides = [1, 1]} : vector<128x4xi32> to vector<128x1xi32>
    %6 = vector.broadcast %5 : vector<128x1xi32> to vector<128x512xi32>
    %7 = arith.cmpi eq, %1, %6 : vector<128x512xi32>
    %8 = arith.ori %4, %7 : vector<128x512xi1>
    %9 = vector.extract_strided_slice %0 {offsets = [0, 2], sizes = [128, 1], strides = [1, 1]} : vector<128x4xi32> to vector<128x1xi32>
    %10 = vector.broadcast %9 : vector<128x1xi32> to vector<128x512xi32>
    %11 = arith.cmpi eq, %1, %10 : vector<128x512xi32>
    %12 = arith.ori %8, %11 : vector<128x512xi1>
    %13 = vector.extract_strided_slice %0 {offsets = [0, 3], sizes = [128, 1], strides = [1, 1]} : vector<128x4xi32> to vector<128x1xi32>
    %14 = vector.broadcast %13 : vector<128x1xi32> to vector<128x512xi32>
    %15 = arith.cmpi eq, %1, %14 : vector<128x512xi32>
    %16 = arith.ori %12, %15 : vector<128x512xi1>
    %17 = arith.extui %16 : vector<128x512xi1> to vector<128x512xi32>
    %18 = arith.sitofp %17 : vector<128x512xi32> to vector<128x512xf32>
    %19 = arith.truncf %18 : vector<128x512xf32> to vector<128x512xbf16>
    %c0_1 = arith.constant 0 : index
    %c0_2 = arith.constant 0 : index
    %20 = vector.load %arg2[%c0_1, %c0_2] : memref<512x128xbf16, #tpu.memory_space<vmem>>, vector<512x128xbf16>
    %cst = arith.constant dense<0.000000e+00> : vector<128x128xf32>
    %21 = tpu.matmul %19, %20, %cst {dimension_numbers = #tpu.dot_dimension_numbers<[1], [0], [0], [1], [0, 0, 1, 1], [], []>} : vector<128x512xbf16>, vector<512x128xbf16>, vector<128x128xf32> -> vector<128x128xf32>
    %c0_3 = arith.constant 0 : index
    %c0_4 = arith.constant 0 : index
    %22 = vector.load %arg3[%c0_3, %c0_4] : memref<1x128xf32, #tpu.memory_space<vmem>>, vector<1x128xf32>
    %23 = vector.broadcast %22 : vector<1x128xf32> to vector<128x128xf32>
    %24 = arith.addf %21, %23 : vector<128x128xf32>
    %cst_5 = arith.constant 0.000000e+00 : f32
    %25 = vector.broadcast %cst_5 : f32 to vector<128x128xf32>
    %26 = arith.maximumf %24, %25 : vector<128x128xf32>
    %27 = arith.truncf %26 : vector<128x128xf32> to vector<128x128xbf16>
    %c0_6 = arith.constant 0 : index
    %c0_7 = arith.constant 0 : index
    %28 = vector.load %arg4[%c0_6, %c0_7] : memref<128x128xbf16, #tpu.memory_space<vmem>>, vector<128x128xbf16>
    %cst_8 = arith.constant dense<0.000000e+00> : vector<128x128xf32>
    %29 = tpu.matmul %27, %28, %cst_8 {dimension_numbers = #tpu.dot_dimension_numbers<[1], [0], [0], [1], [0, 0, 1, 1], [], []>} : vector<128x128xbf16>, vector<128x128xbf16>, vector<128x128xf32> -> vector<128x128xf32>
    %c0_9 = arith.constant 0 : index
    %c0_10 = arith.constant 0 : index
    %30 = vector.load %arg5[%c0_9, %c0_10] : memref<1x128xf32, #tpu.memory_space<vmem>>, vector<1x128xf32>
    %31 = vector.broadcast %30 : vector<1x128xf32> to vector<128x128xf32>
    %32 = arith.addf %29, %31 : vector<128x128xf32>
    %cst_11 = arith.constant dense<0xFF800000> : vector<128xf32>
    %33 = vector.multi_reduction <maximumf>, %32, %cst_11 [1] : vector<128x128xf32> to vector<128xf32>
    %34 = vector.shape_cast %33 : vector<128xf32> to vector<128x1xf32>
    %35 = vector.broadcast %34 : vector<128x1xf32> to vector<128x128xf32>
    %36 = arith.subf %32, %35 : vector<128x128xf32>
    %37 = math.exp %36 : vector<128x128xf32>
    %cst_12 = arith.constant dense<0.000000e+00> : vector<128xf32>
    %38 = vector.multi_reduction <add>, %37, %cst_12 [1] : vector<128x128xf32> to vector<128xf32>
    %39 = vector.shape_cast %38 : vector<128xf32> to vector<128x1xf32>
    %40 = math.log %39 : vector<128x1xf32>
    %41 = vector.broadcast %40 : vector<128x1xf32> to vector<128x128xf32>
    %42 = arith.subf %36, %41 : vector<128x128xf32>
    %c0_13 = arith.constant 0 : index
    %c0_14 = arith.constant 0 : index
    %43 = vector.load %arg6[%c0_13, %c0_14] : memref<128x128xf32, #tpu.memory_space<vmem>>, vector<128x128xf32>
    tpu.vector_store %arg6[%c0_13, %c0_14], %42 {strides = array<i32>} : memref<128x128xf32, #tpu.memory_space<vmem>>, vector<128x128xf32>,
    return
  }
  func.func @transform_0(%arg0: i32) -> (i32, i32) {
    %c0_i32 = arith.constant 0 : i32
    %c0_i32_0 = arith.constant 0 : i32
    return %arg0, %c0_i32 : i32, i32
  }
  func.func @transform_1(%arg0: i32) -> (i32, i32) {
    %c0_i32 = arith.constant 0 : i32
    %c0_i32_0 = arith.constant 0 : i32
    %c0_i32_1 = arith.constant 0 : i32
    return %c0_i32, %c0_i32_0 : i32, i32
  }
  func.func @transform_2(%arg0: i32) -> (i32, i32) {
    %c0_i32 = arith.constant 0 : i32
    %c0_i32_0 = arith.constant 0 : i32
    %c0_i32_1 = arith.constant 0 : i32
    return %c0_i32, %c0_i32_0 : i32, i32
  }
  func.func @transform_3(%arg0: i32) -> (i32, i32) {
    %c0_i32 = arith.constant 0 : i32
    %c0_i32_0 = arith.constant 0 : i32
    %c0_i32_1 = arith.constant 0 : i32
    return %c0_i32, %c0_i32_0 : i32, i32
  }
  func.func @transform_4(%arg0: i32) -> (i32, i32) {
    %c0_i32 = arith.constant 0 : i32
    %c0_i32_0 = arith.constant 0 : i32
    %c0_i32_1 = arith.constant 0 : i32
    return %c0_i32, %c0_i32_0 : i32, i32
  }
  func.func @transform_5(%arg0: i32) -> (i32, i32) {
    %c0_i32 = arith.constant 0 : i32
    %c0_i32_0 = arith.constant 0 : i32
    return %arg0, %c0_i32 : i32, i32
  }
}

</mosaic_0001>

<bundles_post_ra>
// kernel: tpu_custom_call.1
= control target key start
LH: loop header
LB: loop body
LE: loop exit
PB: predicated region body
PF: predicated region fallthrough
CT: control target
= control target key end

     0   :  { %10 = vsyncpa [#allocation3], 0  ;;  %s4015_s0 = inlined_call_operand.vmem [shape: s32[256,4], index: 0, kind: input, shape index: {}]   ;;  %s4016_s1 = inlined_call_operand.vmem [shape: bf16[512,128], index: 1, kind: input, shape index: {}]   ;;  %s4017_s2 = inlined_call_operand.vmem [shape: f32[1,128], index: 2, kind: input, shape index: {}]   ;;  %s4018_s3 = inlined_call_operand.hbm [shape: bf16[128,128], index: 3, kind: input, shape index: {}]   ;;  %s4019_s4 = inlined_call_operand.vmem [shape: f32[1,128], index: 4, kind: input, shape index: {}]   ;;  %s4020_s5 = inlined_call_operand.hbm [shape: f32[256,128], index: 5, kind: output, shape index: {}]  }
   0x1   :  { %11 = vsyncpa [#allocation4], 0 }
   0x2   :  { %13 = vsyncpa [#allocation4 + $0x1], 0  ;;  %s2693_s18 = smov 0   ;;  %s2695_s19 = smov 0  }
   0x3   :  { %s2697_s20 = smov 0   ;;  %s2699_s21 = smov 0  }
   0x4 LB: > { %s2714_s22 = sadd.s32 4294967295, %s2650_s21   ;;  %s1976_s23 = sadd.s32 4294967294, %s2650_s21   ;;  %s2650_s21 = sphi %s2699_s21, %s4084_s21   ;;  %s2646_s20 = sphi %s2697_s20, %s4083_s20   ;;  %s2642_s19 = sphi %s2695_s19, %s4082_s19   ;;  %s2638_s18 = sphi %s2693_s18, %s4081_s18  }
   0x5   : > { %s2718_s24 = sadd.s32 1, %s2650_s21   ;;  %s136_s25 = sadd.s32 1, %s2646_s20 }
   0x6   : > { %s133_s26 = ssub.s32 %s2650_s21, %s2718_s24  ;;  %p146_p0 = scmp.ne.s32.totalorder %s2646_s20, %s2642_s19 }
   0x7   : > { %p134_p1 = scmp.eq.s32.totalorder %s133_s26, 0  ;;  %p147_p2 = scmp.eq.s32.totalorder %s2714_s22, 1 }
   0x8   : > { %p152_p3 = scmp.ne.s32.totalorder %s2642_s19, %s2638_s18  ;;  %p153_p4 = scmp.eq.s32.totalorder %s1976_s23, 1 }
   0x9   : > { %s2729_s27 = scalar_select %p134_p1, %s2646_s20, %s136_s25  }
   0xa   : > { %p2731_p5 = por %p147_p2, %p146_p0  ;;  %p2735_p6 = por %p153_p4, %p152_p3 }
   0xb   : > { %p1977_p7 = scmp.ge.s32.totalorder %s2650_s21, 1  ;;  %p160_p8 = scmp.lt.s32.totalorder %s2650_s21, 3 }
   0xc   : > { %s4024_s28 = scalar_select %p2731_p5, 1, 0 }
   0xd   : > { %s4025_s29 = scalar_select %p2735_p6, 1, 0 }
   0xe   : > { %p4021_p9 = scmp.eq.s32.totalorder %s2714_s22, 0  ;;  %p2742_p10 = pnand %p1977_p7, %p160_p8 }
   0xf   : > { %s2652_s6 = smov [#allocation2]   ;;  %s2556_s11 = scalar_lea.hbm %s4018_s3, 1024 }
  0x10   : > { %s4026_s30 = scalar_select %p2742_p10, 1, 0 }
  0x11   : > { %s178_s7 = sshll.u32 %s2652_s6, 4  ;;  %p2359_p11 = pneg %p2742_p10  ;;  %s179_s7 = int_to_ptr.vmem [resolvable:$true] %s178_s7 }
  0x12   : > { %p2557_p13 = scmp.ne.s32.totalorder %s4018_s3, %s2556_s11  ;;  %p2563_p3 = scmp.lt.u32.totalorder %s2556_s11, %s4018_s3 }
  0x13   : > { %p2750_p12 = pnand %p4021_p9, %p2359_p11 }
  0x15   : > { %p2558_p0 = pneg %p2750_p12 }
  0x17   : > { %p2559_p1 = pnand %p2558_p0, %p2557_p13 }
  0x19   : > { %p2560_p2 = pneg %p2559_p1 }
  0x1b   : > { %p2565_p4 = pnand %p2563_p3, %p2560_p2 }
  0x1d   : > { %2568 = shalt.err (!%p2565_p4)
}
  0x1e   : > { %s2569_s16 = scalar_lea.vmem %s179_s7, 1024  ;;  %p2577_p9 = scmp.lt.s32.totalorder %s179_s7, %s179_s7 }
  0x1f   : > { %p2570_p7 = scmp.ne.s32.totalorder %s179_s7, %s2569_s16  ;;  %p2578_p6 = scmp.lt.s32.totalorder %s2569_s16, %s2569_s16 }
  0x21   : > { %p2572_p8 = pnand %p2570_p7, %p2558_p0  ;;  %p2579_p5 = por %p2578_p6, %p2577_p9 }
  0x23   : > { %p2573_p11 = pneg %p2572_p8 }
  0x25   : > { %p2580_p10 = pnand %p2579_p5, %p2573_p11 }
  0x27   : > { %2583 = shalt.err (!%p2580_p10)
}
  0x28   : > { %s2653_s17 = smov 64   ;;  %s2654_s23 = smov 4  }
  0x29   : > { %2362 = dma.hbm_to_vmem [thread:$0]  (!%p2750_p12), %s4018_s3, 1024, %s179_s7, [#allocation3], %s2653_s17, %s2653_s17, %s2654_s23  }
  0x2a   : > { %p4028_p13 = scmp.ne.s32.totalorder %s4026_s30, 0 }
  0x2b   : > { %p4029_p1 = scmp.eq.s32.totalorder (!%p4028_p13), %s2714_s22, 0 }
  0x2c   : > { %206 = sbr.rel (%p4028_p13) target bundleno = 1223 (0x4c7), region = 40 }
  0x33   : > { %2629 = dma.done.wait (%p4029_p1), [#allocation3], 1024   ;;  %p4030_p0 = pmov %p4029_p1 }
  0x34   : > { %s1983_s6 = sshll.u32 %s2714_s22, 4  ;;  %v2655_v0 = vmov 2   ;;  %v2656_v1 = vmov 1   ;;  %v2657_v5 = vmov 3   ;;  %v2452_v9 = vld [vmem:[%s4016_s1 + $0x40] sm:$0xff]   ;;  %v2658_v13 = vmov 0  }
  0x35   : > { %2631 = vsyncadd (%p4030_p0), [#allocation3], 4294966272  ;;  %2413 = vset.pattern.permute.xlu0 %v2655_v0  ;;  %2412 = vset.pattern.permute.xlu1 %v2656_v1  ;;  %p235_p5 = scmp.lt.s32.totalorder %s1983_s6, 31  ;;  %v2453_v10 = vld [vmem:[%s4016_s1 + $0xc0] sm:$0xff]   ;;  %v2456_v14 = vld [vmem:[%s4016_s1 + $0x48] sm:$0xff]   ;;  %s231_s17 = sand.u32 1, %s2642_s19  }
  0x36   : > { %2161 = vmatprep.subr.bf16.mxu0 %v2452_v9  ;;  %2225 = vmatprep.subr.bf16.mxu1 %v2453_v10  ;;  %v2454_v11 = vld [vmem:[%s4016_s1] sm:$0xff]   ;;  %v2457_v15 = vld [vmem:[%s4016_s1 + $0xc8] sm:$0xff]   ;;  %v2460_v19 = vld [vmem:[%s4016_s1 + $0x50] sm:$0xff]   ;;  %s1982_s23 = sshll.u32 %s231_s17, 7  ;;  %s2160_s26 = sshll.u32 %s2714_s22, 11 }
  0x37   : > { %s4086_s6 = smov (!%p235_p5, %s1983_s6), 31  ;;  %v2455_v12 = vld [vmem:[%s4016_s1 + $0x80] sm:$0xff]   ;;  %2162 = vmatpush3.bf16.msra.mxu0 %v2454_v11  ;;  %v2458_v16 = vld [vmem:[%s4016_s1 + $0x8] sm:$0xff]   ;;  %v2461_v20 = vld [vmem:[%s4016_s1 + $0xd0] sm:$0xff]   ;;  %s3930_s25 = scalar_lea.vmem [#allocation5], %s1982_s23 }
  0x38   : > { %s1984_s7 = sshll.u32 %s4086_s6, 3  ;;  %2226 = vmatpush3.bf16.msra.mxu1 %v2455_v12  ;;  %v2459_v17 = vld [vmem:[%s4016_s1 + $0x88] sm:$0xff]   ;;  %2163 = vmatprep.subr.bf16.mxu0 %v2456_v14  ;;  %v2462_v21 = vld [vmem:[%s4016_s1 + $0x10] sm:$0xff]   ;;  %v2464_v24 = vld [vmem:[%s4016_s1 + $0x58] sm:$0xff]   ;;  %s1902_s6 = sshll.u32 %s3930_s25, 4  ;;  %s3967_s6 = int_to_ptr.vmem [resolvable:$true] %s1902_s6 }
  0x39   : > { %s2782_s9 = scalar_lea.vmem %s4015_s0, %s1984_s7  ;;  %2227 = vmatprep.subr.bf16.mxu1 %v2457_v15  ;;  %v2463_v22 = vld [vmem:[%s4016_s1 + $0x90] sm:$0xff]   ;;  %v2465_v25 = vld [vmem:[%s4016_s1 + $0xd8] sm:$0xff]   ;;  %v2468_v29 = vld [vmem:[%s4016_s1 + $0x60] sm:$0xff]   ;;  %s3965_s30 = scalar_lea.hbm %s4020_s5, %s2160_s26 }
  0x3a   : > { %v2785_v2 = vld [vmem:[%s2782_s9] sm:$0xff]  ;;  %v2790_v3 = vld [vmem:[%s2782_s9 + $0x18] sm:$0xff]  ;;  %v2793_v4 = vld [vmem:[%s2782_s9 + $0x8] sm:$0xff]  ;;  %s3974_s22 = scalar_lea.sflag [#allocation4], %s231_s17  ;;  %s2584_s10 = scalar_lea.vmem %s3967_s6, 2048 }
  0x3b   : > { %552 = vperm.xlu0 %2413, %v2785_v2   ;;  %376 = vperm.xlu1 %2412, %v2785_v2   ;;  %v2800_v6 = vld [vmem:[%s2782_s9 + $0x20] sm:$0xff]  ;;  %v2805_v7 = vld [vmem:[%s2782_s9 + $0x38] sm:$0xff]  ;;  %v2811_v8 = vld [vmem:[%s2782_s9 + $0x10] sm:$0xff]  ;;  %p2585_p6 = scmp.ne.s32.totalorder %s3967_s6, %s2584_s10  ;;  %p4079_p9 = scmp.ne.s32.totalorder %s4024_s28, 0 }
  0x3c   : > { %v2842_v18 = vld [vmem:[%s2782_s9 + $0x28] sm:$0xff]  ;;  %2164 = vmatpush3.bf16.msra.mxu0 %v2458_v16  ;;  %2228 = vmatpush3.bf16.msra.mxu1 %v2459_v17  ;;  %v2859_v23 = vld [vmem:[%s2782_s9 + $0x40] sm:$0xff]  ;;  %v2466_v26 = vld [vmem:[%s4016_s1 + $0x18] sm:$0xff]   ;;  %s2660_s11 = smov [#allocation5]  }
  0x3d   : > { %2165 = vmatprep.subr.bf16.mxu0 %v2460_v19  ;;  %2229 = vmatprep.subr.bf16.mxu1 %v2461_v20  ;;  %v2467_v27 = vld [vmem:[%s4016_s1 + $0x98] sm:$0xff]   ;;  %v2469_v30 = vld [vmem:[%s4016_s1 + $0xe0] sm:$0xff]   ;;  %v2472_v33 = vld [vmem:[%s4016_s1 + $0x68] sm:$0xff]   ;;  %v2659_v20 = vmov 1.0|1.0   ;;  %p2586_p10 = pnand %p2585_p6, %p4079_p9  ;;  %s2588_s12 = sshll.u32 %s2660_s11, 4  ;;  %s2589_s12 = int_to_ptr.vmem [resolvable:$false] %s2588_s12 }
  0x3e   : > { %v2877_v28 = vld [vmem:[%s2782_s9 + $0x58] sm:$0xff]  ;;  %v2470_v31 = vld [vmem:[%s4016_s1 + $0x20] sm:$0xff]   ;;  %v2473_v34 = vld [vmem:[%s4016_s1 + $0xe8] sm:$0xff]   ;;  %s2590_s13 = scalar_lea.vmem %s2589_s12, 4096  ;;  %p2591_p2 = scmp.lt.s32.totalorder %s3967_s6, %s2589_s12 }
  0x3f   : > { %561 = vperm.xlu0 %2413, %v2790_v3   ;;  %379 = vperm.xlu1 %2412, %v2793_v4   ;;  %v2471_v32 = vld [vmem:[%s4016_s1 + $0xa0] sm:$0xff]   ;;  %v2474_v35 = vld [vmem:[%s4016_s1 + $0x28] sm:$0xff]   ;;  %v2476_v37 = vld [vmem:[%s4016_s1 + $0x70] sm:$0xff]   ;;  %p2587_p12 = pneg %p2586_p10  ;;  %p2592_p3 = scmp.lt.s32.totalorder %s2590_s13, %s2584_s10 }
  0x40   : > { %2166 = vmatpush3.bf16.msra.mxu0 %v2462_v21  ;;  %2230 = vmatpush3.bf16.msra.mxu1 %v2463_v22  ;;  %v2475_v36 = vld [vmem:[%s4016_s1 + $0xa8] sm:$0xff]   ;;  %v2477_v38 = vld [vmem:[%s4016_s1 + $0xf0] sm:$0xff]   ;;  %v2480_v41 = vld [vmem:[%s4016_s1 + $0x78] sm:$0xff]  }
  0x41   : > { %2167 = vmatprep.subr.bf16.mxu0 %v2464_v24  ;;  %2231 = vmatprep.subr.bf16.mxu1 %v2465_v25  ;;  %v2478_v39 = vld [vmem:[%s4016_s1 + $0x30] sm:$0xff]   ;;  %v2481_v42 = vld [vmem:[%s4016_s1 + $0xf8] sm:$0xff]   ;;  %v2946_v46 = vld [vmem:[%s2782_s9 + $0x68] sm:$0xff]  ;;  %v4043_v24 = vmov 0  ;;  %p2593_p4 = por %p2592_p3, %p2591_p2 }
  0x42   : > { %v2479_v40 = vld [vmem:[%s4016_s1 + $0xb0] sm:$0xff]   ;;  %v2482_v43 = vld [vmem:[%s4016_s1 + $0x38] sm:$0xff]   ;;  %v251_v48 = vld [vmem:[%s2782_s9 + $0x48] sm:$0xff] }
  0x43   : > { %2419 = vset.pattern.permute.xlu0 %v2657_v5  ;;  %2414 = vset.pattern.permute.xlu1 %v2655_v0  ;;  %v2483_v44 = vld [vmem:[%s4016_s1 + $0xb8] sm:$0xff]   ;;  %v252_v45 = vld [vmem:[%s2782_s9 + $0x50] sm:$0xff]  ;;  %v2957_v49 = vld [vmem:[%s2782_s9 + $0x60] sm:$0xff]  ;;  %p2594_p7 = pnand %p2593_p4, %p2587_p12 }
  0x44   : > { %731 = vperm.xlu0 %2419, %v2793_v4   ;;  %555 = vperm.xlu1 %2414, %v2793_v4   ;;  %v248_v47 = vld [vmem:[%s2782_s9 + $0x30] sm:$0xff]  ;;  %v2974_v51 = vld [vmem:[%s2782_s9 + $0x78] sm:$0xff] }
  0x45   : > { %2168 = vmatpush3.bf16.msra.mxu0 %v2466_v26  ;;  %2232 = vmatpush3.bf16.msra.mxu1 %v2467_v27  ;;  %v2966_v50 = vld [vmem:[%s2782_s9 + $0x70] sm:$0xff]  ;;  %v4045_v26 = vmov 0  ;;  %v4050_v27 = vmov 0 }
  0x46   : > { %2169 = vmatprep.subr.bf16.mxu0 %v2468_v29  ;;  %2233 = vmatprep.subr.bf16.mxu1 %v2469_v30  ;;  %v4054_v30 = vmov 0 }
  0x48   : > { %740 = vperm.xlu0 %2419, %v2800_v6   ;;  %2415 = vset.pattern.permute.xlu1 %v2657_v5 }
  0x49   : > { %728 = vperm.xlu1 %2415, %v2785_v2   ;;  %2170 = vmatpush3.bf16.msra.mxu0 %v2470_v31 }
  0x4a   : > { %2234 = vmatpush3.bf16.msra.mxu1 %v2471_v32  ;;  %2171 = vmatprep.subr.bf16.mxu0 %v2472_v33  ;;  %v4057_v32 = vmov 0  ;;  %v4061_v33 = vmov 0 }
  0x4b   : > { %2235 = vmatprep.subr.bf16.mxu1 %v2473_v34 }
  0x4c   : > { %749 = vperm.xlu0 %2419, %v2805_v7  }
  0x4d   : > { %2416 = vset.pattern.permute.xlu1 %v2658_v13  ;;  %2172 = vmatpush3.bf16.msra.mxu0 %v2474_v35 }
  0x4e   : > { %270 = vperm.xlu1 %2416, %v2811_v8   ;;  %2236 = vmatpush3.bf16.msra.mxu1 %v2475_v36 }
  0x4f   : > { %2173 = vmatprep.subr.bf16.mxu0 %v2476_v37  ;;  %2237 = vmatprep.subr.bf16.mxu1 %v2477_v38 }
  0x50   : > { %2429 = vset.pattern.permute.xlu0 %v2656_v1 }
  0x51   : > { %382 = vperm.xlu0 %2429, %v2811_v8   ;;  %2174 = vmatpush3.bf16.msra.mxu0 %v2478_v39 }
  0x52   : > { %273 = vperm.xlu1 %2416, %v2790_v3   ;;  %2238 = vmatpush3.bf16.msra.mxu1 %v2479_v40 }
  0x53   : > { %2175 = vmatprep.subr.bf16.mxu0 %v2480_v41  ;;  %2239 = vmatprep.subr.bf16.mxu1 %v2481_v42 }
  0x55   : > { %391 = vperm.xlu0 %2429, %v2842_v18   ;;  %2176 = vmatpush3.bf16.msra.mxu0 %v2482_v43 }
  0x56   : > { %2417 = vset.pattern.permute.xlu1 %v2656_v1  ;;  %2240 = vmatpush3.bf16.msra.mxu1 %v2483_v44 }
  0x57   : > { %385 = vperm.xlu1 %2417, %v2790_v3  }
  0x59   : > { %400 = vperm.xlu0 %2429, %v2859_v23  }
  0x5b   : > { %2418 = vset.pattern.permute.xlu1 %v2655_v0 }
  0x5c   : > { %558 = vperm.xlu1 %2418, %v2811_v8  }
  0x5d   : > { %409 = vperm.xlu0 %2429, %v2877_v28  }
  0x60   : > { %2420 = vset.pattern.permute.xlu1 %v2657_v5 }
  0x61   : > { %2436 = vset.pattern.permute.xlu0 %v2658_v13  ;;  %734 = vperm.xlu1 %2420, %v2811_v8  }
  0x62   : > { %264 = vperm.xlu0 %2436, %v2785_v2  }
  0x65   : > { %737 = vperm.xlu1 %2420, %v2790_v3   ;;  %v258_v3 = vlaneseq }
  0x66   : > { %267 = vperm.xlu0 %2436, %v2793_v4  }
  0x69   : > { %2421 = vset.pattern.permute.xlu1 %v2658_v13 }
  0x6a   : > { %279 = vperm.xlu1 %2421, %v2842_v18   ;;  %276 = vperm.xlu0 %2436, %v2800_v6  }
  0x6e   : > { %2422 = vset.pattern.permute.xlu1 %v2656_v1  ;;  %285 = vperm.xlu0 %2436, %v2805_v7  }
  0x6f   : > { %388 = vperm.xlu1 %2422, %v2800_v6  }
  0x72   : > { %294 = vperm.xlu0 %2436, %v252_v45  }
  0x73   : > { %2423 = vset.pattern.permute.xlu1 %v2655_v0 }
  0x74   : > { %564 = vperm.xlu1 %2423, %v2800_v6  }
  0x76   : > { %303 = vperm.xlu0 %2436, %v2946_v46  }
  0x78   : > { %567 = vperm.xlu1 %2423, %v2842_v18  }
  0x7a   : > { %2440 = vset.pattern.permute.xlu0 %v2655_v0 }
  0x7b   : > { %570 = vperm.xlu0 %2440, %v248_v47  }
  0x7c   : > { %2424 = vset.pattern.permute.xlu1 %v2657_v5 }
  0x7d   : > { %743 = vperm.xlu1 %2424, %v2842_v18  }
  0x7f   : > { %579 = vperm.xlu0 %2440, %v251_v48  }
  0x81   : > { %2425 = vset.pattern.permute.xlu1 %v2658_v13 }
  0x82   : > { %282 = vperm.xlu1 %2425, %v248_v47  }
  0x83   : > { %588 = vperm.xlu0 %2440, %v2957_v49  }
  0x86   : > { %2426 = vset.pattern.permute.xlu1 %v2656_v1 }
  0x87   : > { %394 = vperm.xlu1 %2426, %v248_v47   ;;  %2442 = vset.pattern.permute.xlu0 %v2657_v5 }
  0x88   : > { %758 = vperm.xlu0 %2442, %v252_v45  }
  0x8b   : > { %397 = vperm.xlu1 %2426, %v2805_v7  }
  0x8c   : > { %767 = vperm.xlu0 %2442, %v2946_v46  }
  0x8f   : > { %2427 = vset.pattern.permute.xlu1 %v2655_v0 }
  0x90   : > { %573 = vperm.xlu1 %2427, %v2805_v7   ;;  %2446 = vset.pattern.permute.xlu0 %v2656_v1  ;;  %v3028_v7 = vand.u32 127, %v258_v3  ;;  %v2488_v3 = vld [vmem:[#allocation2 + $0x20] sm:$0xff]  }
  0x91   : > { %418 = vperm.xlu0 %2446, %v2966_v50  }
  0x92   : > { %v3037_v10 = vadd.s32 128, %v3028_v7  ;;  %v3043_v12 = vadd.s32 384, %v3028_v7 }
  0x94   : > { %2428 = vset.pattern.permute.xlu1 %v2657_v5 }
  0x95   : > { %746 = vperm.xlu1 %2428, %v248_v47   ;;  %2449 = vset.pattern.permute.xlu0 %v2655_v0 }
  0x96   : > { %597 = vperm.xlu0 %2449, %v2974_v51  }
  0x99   : > { %2430 = vset.pattern.permute.xlu1 %v2658_v13 }
  0x9a   : > { %288 = vperm.xlu1 %2430, %v2859_v23   ;;  %2451 = vset.pattern.permute.xlu0 %v2657_v5 }
  0x9e   : > { %291 = vperm.xlu1 %2430, %v251_v48  }
  0xa2   : > { %2431 = vset.pattern.permute.xlu1 %v2656_v1 }
  0xa3   : > { %403 = vperm.xlu1 %2431, %v251_v48  }
  0xa7   : > { %2432 = vset.pattern.permute.xlu1 %v2655_v0 }
  0xa8   : > { %576 = vperm.xlu1 %2432, %v2859_v23  }
  0xac   : > { %2433 = vset.pattern.permute.xlu1 %v2657_v5 }
  0xad   : > { %752 = vperm.xlu1 %2433, %v2859_v23  }
  0xb1   : > { %755 = vperm.xlu1 %2433, %v251_v48  }
  0xb5   : > { %2434 = vset.pattern.permute.xlu1 %v2658_v13 }
  0xb6   : > { %297 = vperm.xlu1 %2434, %v2877_v28  }
  0xba   : > { %2435 = vset.pattern.permute.xlu1 %v2656_v1  ;;  %v2989_v52 = vpop.permute.xlu1 %376  ;;  %v2991_v53 = vpop.permute.xlu0 %552 }
  0xbb   : > { %406 = vperm.xlu1 %2435, %v252_v45   ;;  %vm600_vm0 = vcmp.eq.s32.totalorder %v3037_v10, %v2991_v53  ;;  %vm424_vm3 = vcmp.eq.s32.totalorder %v3037_v10, %v2989_v52  ;;  %vm426_vm10 = vcmp.eq.s32.totalorder %v3043_v12, %v2989_v52 }
  0xbe   : > { %v2993_v54 = vpop.permute.xlu1 %379  ;;  %v2995_v55 = vpop.permute.xlu0 %561 }
  0xbf   : > { %2437 = vset.pattern.permute.xlu1 %v2655_v0  ;;  %vm428_vm13 = vcmp.eq.s32.totalorder %v3037_v10, %v2993_v54 }
  0xc0   : > { %582 = vperm.xlu1 %2437, %v252_v45  }
  0xc3   : > { %v2998_v56 = vpop.permute.xlu1 %555  ;;  %v3000_v57 = vpop.permute.xlu0 %731 }
  0xc4   : > { %585 = vperm.xlu1 %2437, %v2877_v28   ;;  %vm780_vm14 = vcmp.eq.s32.totalorder %v3037_v10, %v3000_v57 }
  0xc7   : > { %v3003_v58 = vpop.permute.xlu0 %740 }
  0xc8   : > { %2438 = vset.pattern.permute.xlu1 %v2657_v5  ;;  %v3006_v59 = vpop.permute.xlu1 %728 }
  0xc9   : > { %761 = vperm.xlu1 %2438, %v2877_v28   ;;  %vm776_vm7 = vcmp.eq.s32.totalorder %v3037_v10, %v3006_v59  ;;  %v3189_v28 = vadd.s32 256, %v3028_v7 }
  0xcb   : > { %v3009_v60 = vpop.permute.xlu0 %749 }
  0xcd   : > { %2439 = vset.pattern.permute.xlu1 %v2658_v13  ;;  %v3012_v61 = vpop.permute.xlu1 %270 }
  0xce   : > { %300 = vperm.xlu1 %2439, %v2957_v49   ;;  %vm320_vm8 = vcmp.eq.s32.totalorder %v3037_v10, %v3012_v61 }
  0xd0   : > { %v3015_v62 = vpop.permute.xlu0 %382 }
  0xd1   : > { %v3017_v63 = vpop.permute.xlu1 %273  ;;  %vm432_vm1 = vcmp.eq.s32.totalorder %v3037_v10, %v3015_v62 }
  0xd2   : > { %2441 = vset.pattern.permute.xlu1 %v2656_v1  ;;  %vm3073_vm11 = vmor %vm320_vm8, %vm432_vm1  ;;  %vm604_vm1 = vcmp.eq.s32.totalorder %v3037_v10, %v2998_v56  ;;  %vm430_vm8 = vcmp.eq.s32.totalorder %v3043_v12, %v2993_v54 }
  0xd3   : > { %412 = vperm.xlu1 %2441, %v2957_v49  }
  0xd4   : > { %v3021_v2 = vpop.permute.xlu0 %391 }
  0xd6   : > { %v3023_v4 = vpop.permute.xlu1 %385 }
  0xd7   : > { %415 = vperm.xlu1 %2441, %v2946_v46  }
  0xd8   : > { %v3026_v6 = vpop.permute.xlu0 %400 }
  0xdb   : > { %2443 = vset.pattern.permute.xlu1 %v2655_v0  ;;  %v3031_v8 = vpop.permute.xlu1 %558 }
  0xdc   : > { %591 = vperm.xlu1 %2443, %v2946_v46   ;;  %v3034_v9 = vpop.permute.xlu0 %409 }
  0xe0   : > { %2444 = vset.pattern.permute.xlu1 %v2657_v5  ;;  %v3040_v11 = vpop.permute.xlu1 %734 }
  0xe1   : > { %v3045_v14 = vpop.permute.xlu0 %264  ;;  %764 = vperm.xlu1 %2444, %v2957_v49  }
  0xe2   : > { %vm312_vm2 = vcmp.eq.s32.totalorder %v3037_v10, %v3045_v14  ;;  %vm314_vm5 = vcmp.eq.s32.totalorder %v3043_v12, %v3045_v14 }
  0xe3   : > { %vm488_vm4 = vmor %vm312_vm2, %vm424_vm3 }
  0xe4   : > { %v3058_v15 = vpop.permute.xlu1 %737  ;;  %vm664_vm6 = vmor %vm488_vm4, %vm600_vm0  ;;  %vm436_vm4 = vcmp.eq.s32.totalorder %v3037_v10, %v3023_v4 }
  0xe5   : > { %v3064_v16 = vpop.permute.xlu0 %267  ;;  %2445 = vset.pattern.permute.xlu1 %v2658_v13  ;;  %vm3067_vm9 = vmor %vm664_vm6, %vm776_vm7 }
  0xe6   : > { %306 = vperm.xlu1 %2445, %v2966_v50   ;;  %vm316_vm12 = vcmp.eq.s32.totalorder %v3037_v10, %v3064_v16  ;;  %vm3084_vm15 = vmor %vm314_vm5, %vm426_vm10  ;;  %vm318_vm3 = vcmp.eq.s32.totalorder %v3043_v12, %v3064_v16  ;;  %vm602_vm5 = vcmp.eq.s32.totalorder %v3043_v12, %v2991_v53  ;;  %vm324_vm10 = vcmp.eq.s32.totalorder %v3037_v10, %v3017_v63 }
  0xe7   : > { %vm492_vm0 = vmor %vm316_vm12, %vm428_vm13 }
  0xe8   : > { %vm668_vm2 = vmor %vm492_vm0, %vm604_vm1  ;;  %vm434_vm0 = vcmp.eq.s32.totalorder %v3043_v12, %v3015_v62  ;;  %vm606_vm1 = vcmp.eq.s32.totalorder %v3043_v12, %v2998_v56 }
  0xe9   : > { %v3094_v19 = vpop.permute.xlu1 %279  ;;  %vm844_vm6 = vmor %vm668_vm2, %vm780_vm14  ;;  %vm608_vm14 = vcmp.eq.s32.totalorder %v3037_v10, %v3031_v8  ;;  %v3332_v39 = vpop.permute.xlu0 %276 }
  0xea   : > { %309 = vperm.xlu1 %2445, %v2974_v51   ;;  %vm2082_vm7 = vmpackc.low %vm844_vm6, %vm3067_vm9  ;;  %vm438_vm9 = vcmp.eq.s32.totalorder %v3043_v12, %v3023_v4  ;;  %vm778_vm6 = vcmp.eq.s32.totalorder %v3043_v12, %v3006_v59 }
  0xeb   : > { %2083 = vmatprep.mubr.msk.bf16.mxu0 %vm2082_vm7, %v2659_v20  ;;  %vm494_vm12 = vmor %vm318_vm3, %vm430_vm8  ;;  %vm782_vm3 = vcmp.eq.s32.totalorder %v3043_v12, %v3000_v57  ;;  %vm326_vm7 = vcmp.eq.s32.totalorder %v3043_v12, %v3017_v63  ;;  %vm311_vm8 = vcmp.eq.s32.totalorder %v3028_v7, %v3045_v14 }
  0xec   : > { %vm3106_vm13 = vmor %vm324_vm10, %vm436_vm4 }
  0xed   : > { %vm666_vm2 = vmor %vm3084_vm15, %vm602_vm5  ;;  %vm322_vm5 = vcmp.eq.s32.totalorder %v3043_v12, %v3012_v61  ;;  %v3376_v43 = vpop.permute.xlu0 %285 }
  0xee   : > { %vm670_vm4 = vmor %vm494_vm12, %vm606_vm1  ;;  %2447 = vset.pattern.permute.xlu1 %v2656_v1  ;;  %v3145_v25 = vpop.permute.xlu1 %388  ;;  %vm435_vm1 = vcmp.eq.s32.totalorder %v3028_v7, %v3023_v4  ;;  %v4047_v1 = vmov 0 }
  0xef   : > { %vm3128_vm10 = vmor %vm666_vm2, %vm778_vm6  ;;  %421 = vperm.xlu1 %2447, %v2974_v51   ;;  %vm599_vm6 = vcmp.eq.s32.totalorder %v3028_v7, %v2991_v53 }
  0xf0   : > { %vm3134_vm15 = vmor %vm3073_vm11, %vm608_vm14  ;;  %vm315_vm14 = vcmp.eq.s32.totalorder %v3028_v7, %v3064_v16  ;;  %vm423_vm11 = vcmp.eq.s32.totalorder %v3028_v7, %v2989_v52 }
  0xf1   : > { %vm3140_vm12 = vmor %vm326_vm7, %vm438_vm9  ;;  %v3395_v45 = vpop.permute.xlu0 %294 }
  0xf2   : > { %v4044_v24 = vsel %vm3140_vm12, 4294967295, %v4043_v24  ;;  %vm846_vm2 = vmor %vm670_vm4, %vm782_vm3  ;;  %vm323_vm3 = vcmp.eq.s32.totalorder %v3028_v7, %v3017_v63 }
  0xf3   : > { %vm3156_vm9 = vmor %vm322_vm5, %vm434_vm0  ;;  %vm427_vm0 = vcmp.eq.s32.totalorder %v3028_v7, %v2993_v54  ;;  %vm319_vm5 = vcmp.eq.s32.totalorder %v3028_v7, %v3012_v61  ;;  %2448 = vset.pattern.permute.xlu1 %v2655_v0  ;;  %v3198_v29 = vpop.permute.xlu1 %564  ;;  %v4052_v0 = vmov 0 }
  0xf4   : > { %v4046_v26 = vsel %vm3156_vm9, 4294967295, %v4045_v26  ;;  %vm2114_vm7 = vmpackc.low %vm846_vm2, %vm3128_vm10  ;;  %vm4049_vm2 = vcmp.eq.s32.totalorder %v3028_v7, %v3015_v62  ;;  %594 = vperm.xlu1 %2448, %v2966_v50  }
  0xf5   : > { %2115 = vmatprep.mubr.msk.bf16.mxu1 %vm2114_vm7, %v2659_v20  ;;  %vm487_vm4 = vmor %vm311_vm8, %vm423_vm11  ;;  %vm612_vm8 = vcmp.eq.s32.totalorder %v3037_v10, %v2995_v55  ;;  %v3412_v47 = vpop.permute.xlu0 %303 }
  0xf6   : > { %vm3177_vm12 = vmor %vm323_vm3, %vm435_vm1  ;;  %vm603_vm1 = vcmp.eq.s32.totalorder %v3028_v7, %v2998_v56  ;;  %vm775_vm3 = vcmp.eq.s32.totalorder %v3028_v7, %v3006_v59 }
  0xf7   : > { %v4048_v1 = vsel %vm3177_vm12, 4294967295, %v4047_v1  ;;  %vm491_vm10 = vmor %vm315_vm14, %vm427_vm0  ;;  %vm779_vm14 = vcmp.eq.s32.totalorder %v3028_v7, %v3000_v57  ;;  %vm784_vm0 = vcmp.eq.s32.totalorder %v3037_v10, %v3040_v11  ;;  %v3232_v31 = vpop.permute.xlu1 %567 }
  0xf8   : > { %vm3184_vm9 = vmor %vm319_vm5, %vm4049_vm2  ;;  %vm313_vm5 = vcmp.eq.s32.totalorder %v3189_v28, %v3045_v14  ;;  %vm425_vm2 = vcmp.eq.s32.totalorder %v3189_v28, %v2989_v52  ;;  %2450 = vset.pattern.permute.xlu1 %v2657_v5 }
  0xf9   : > { %v4051_v27 = vsel %vm3184_vm9, 4294967295, %v4050_v27  ;;  %vm663_vm11 = vmor %vm487_vm4, %vm599_vm6  ;;  %vm610_vm4 = vcmp.eq.s32.totalorder %v3043_v12, %v3031_v8  ;;  %770 = vperm.xlu1 %2450, %v2966_v50  }
  0xfa   : > { %vm667_vm7 = vmor %vm491_vm10, %vm603_vm1  ;;  %vm317_vm10 = vcmp.eq.s32.totalorder %v3189_v28, %v3064_v16  ;;  %v3429_v49 = vpop.permute.xlu0 %570  ;;  %v2491_v16 = vld [vmem:[#allocation2 + $0x38] sm:$0xff]  }
  0xfb   : > { %vm839_vm6 = vmor %vm663_vm11, %vm775_vm3 }
  0xfc   : > { %vm843_vm1 = vmor %vm667_vm7, %vm779_vm14  ;;  %vm4056_vm14 = vnez %v4046_v26  ;;  %v3290_v35 = vpop.permute.xlu1 %743 }
  0xfd   : > { %vm3218_vm12 = vmor %vm3106_vm13, %vm612_vm8  ;;  %vm429_vm13 = vcmp.eq.s32.totalorder %v3189_v28, %v2993_v54  ;;  %773 = vperm.xlu1 %2450, %v2974_v51   ;;  %v2485_v54 = vld [vmem:[#allocation2 + $0x8] sm:$0xff]  }
  0xfe   : > { %v4053_v0 = vsel %vm3218_vm12, 4294967295, %v4052_v0  ;;  %vm2084_vm3 = vmpackc.low %vm843_vm1, %vm839_vm6  ;;  %vm4059_vm1 = vcmp.eq.s32.totalorder %v3043_v12, %v2995_v55 }
  0xff   : > { %vm3228_vm9 = vmor %vm3134_vm15, %vm784_vm0  ;;  %2085 = vmatmul.mubr.msk.bf16.vlgmr.msra.gmra.mrb[0].mxu0 %vm2084_vm3, %v2659_v20  ;;  %vm607_vm15 = vcmp.eq.s32.totalorder %v3028_v7, %v3031_v8  ;;  %vm4060_vm3 = vnez %v4044_v24  ;;  %vm4064_vm0 = vnez %v4051_v27 }
 0x100   : > { %v4055_v30 = vsel %vm3228_vm9, 4294967295, %v4054_v30  ;;  %vm489_vm8 = vmor %vm313_vm5, %vm425_vm2  ;;  %vm605_vm5 = vcmp.eq.s32.totalorder %v3189_v28, %v2998_v56  ;;  %vm4068_vm9 = vnez %v4048_v1  ;;  %v2486_v56 = vld [vmem:[#allocation2 + $0x10] sm:$0xff]  }
 0x101   : > { %vm3239_vm7 = vmor %vm4056_vm14, %vm610_vm4  ;;  %vm4063_vm4 = vcmp.eq.s32.totalorder %v3189_v28, %v2991_v53  ;;  %vm433_vm14 = vcmp.eq.s32.totalorder %v3189_v28, %v3015_v62  ;;  %v3317_v38 = vpop.permute.xlu1 %282  ;;  %v2484_v53 = vld [vmem:[#allocation2] sm:$0xff]  }
 0x102   : > { %v4058_v32 = vsel %vm3239_vm7, 4294967295, %v4057_v32  ;;  %vm493_vm6 = vmor %vm317_vm10, %vm429_vm13  ;;  %vm781_vm10 = vcmp.eq.s32.totalorder %v3189_v28, %v3000_v57  ;;  %vm437_vm13 = vcmp.eq.s32.totalorder %v3189_v28, %v3023_v4  ;;  %vm4067_vm7 = vcmp.eq.s32.totalorder %v3028_v7, %v2995_v55  ;;  %2305 = vmatprep.subr.bf16.mxu0 %v2484_v53  ;;  %2337 = vmatprep.subr.bf16.mxu1 %v2484_v53 }
 0x103   : > { %vm3252_vm11 = vmor %vm4060_vm3, %vm4059_vm1  ;;  %vm777_vm3 = vcmp.eq.s32.totalorder %v3189_v28, %v3006_v59  ;;  %2306 = vmatpush3.bf16.msra.mxu0 %v2484_v53 }
 0x104   : > { %v4062_v33 = vsel %vm3252_vm11, 4294967295, %v4061_v33  ;;  %vm665_vm2 = vmor %vm489_vm8, %vm4063_vm4  ;;  %vm788_vm4 = vcmp.eq.s32.totalorder %v3037_v10, %v3058_v15  ;;  %2307 = vmatprep.subr.bf16.mxu0 %v2485_v54 }
 0x105   : > { %vm669_vm1 = vmor %vm493_vm6, %vm605_vm5  ;;  %vm325_vm6 = vcmp.eq.s32.totalorder %v3189_v28, %v3017_v63 }
 0x106   : > { %vm3273_vm11 = vmor %vm4064_vm0, %vm607_vm15  ;;  %vm321_vm0 = vcmp.eq.s32.totalorder %v3189_v28, %v3012_v61  ;;  %v3336_v40 = vpop.permute.xlu1 %394 }
 0x107   : > { %vm841_vm8 = vmor %vm665_vm2, %vm777_vm3  ;;  %vm4076_vm3 = vnez %v4055_v30  ;;  %2308 = vmatpush3.bf16.msra.mxu0 %v2485_v54 }
 0x108   : > { %vm3284_vm12 = vmor %vm4068_vm9, %vm4067_vm7  ;;  %vm786_vm9 = vcmp.eq.s32.totalorder %v3043_v12, %v3040_v11  ;;  %2309 = vmatprep.subr.bf16.mxu0 %v2486_v56 }
 0x109   : > { %vm845_vm15 = vmor %vm669_vm1, %vm781_vm10  ;;  %vm4075_vm10 = vnez %v4053_v0 }
 0x10a   : > { %vm3294_vm5 = vmor %vm325_vm6, %vm437_vm13  ;;  %vm790_vm13 = vcmp.eq.s32.totalorder %v3043_v12, %v3058_v15  ;;  %v3353_v41 = vpop.permute.xlu1 %397 }
 0x10b   : > { %vm2116_vm2 = vmpackc.low %vm845_vm15, %vm841_vm8  ;;  %vm783_vm15 = vcmp.eq.s32.totalorder %v3028_v7, %v3040_v11  ;;  %2310 = vmatpush3.bf16.msra.mxu0 %v2486_v56 }
 0x10c   : > { %vm3300_vm7 = vmor %vm321_vm0, %vm433_vm14  ;;  %2117 = vmatmul.mubr.msk.bf16.vlgmr.msra.gmra.mrb[0].mxu1 %vm2116_vm2, %v2659_v20  ;;  %vm4077_vm14 = vnez %v4058_v32  ;;  %vm4078_vm0 = vnez %v4062_v33 }
 0x10d   : > { %vm852_vm1 = vmor %vm4075_vm10, %vm788_vm4  ;;  %vm787_vm4 = vcmp.eq.s32.totalorder %v3028_v7, %v3058_v15  ;;  %2345 = vmatpush3.bf16.msra.mxu1 %v2484_v53 }
 0x10e   : > { %vm2086_vm8 = vmpackc.low %vm852_vm1, %vm4076_vm3  ;;  %vm613_vm3 = vcmp.eq.s32.totalorder %v3189_v28, %v2995_v55  ;;  %2338 = vmatprep.subr.bf16.mxu1 %v2485_v54 }
 0x10f   : > { %2087 = vmatprep.mubr.msk.bf16.mxu0 %vm2086_vm8, %v2659_v20  ;;  %vm850_vm6 = vmor %vm4077_vm14, %vm786_vm9  ;;  %vm609_vm9 = vcmp.eq.s32.totalorder %v3189_v28, %v3031_v8  ;;  %vm785_vm14 = vcmp.eq.s32.totalorder %v3189_v28, %v3040_v11  ;;  %v3364_v42 = vpop.permute.xlu1 %573  ;;  %v2489_v11 = vld [vmem:[#allocation2 + $0x28] sm:$0xff]  }
 0x110   : > { %vm854_vm2 = vmor %vm4078_vm0, %vm790_vm13  ;;  %vm440_vm0 = vcmp.eq.s32.totalorder %v3037_v10, %v3145_v25 }
 0x111   : > { %vm2118_vm10 = vmpackc.low %vm854_vm2, %vm850_vm6  ;;  %vm789_vm6 = vcmp.eq.s32.totalorder %v3189_v28, %v3058_v15  ;;  %2346 = vmatpush3.bf16.msra.mxu1 %v2485_v54  ;;  %v2490_v15 = vld [vmem:[#allocation2 + $0x30] sm:$0xff]  }
 0x112   : > { %2119 = vmatprep.mubr.msk.bf16.mxu1 %vm2118_vm10, %v2659_v20  ;;  %vm847_vm1 = vmor %vm3273_vm11, %vm783_vm15  ;;  %vm332_vm10 = vcmp.eq.s32.totalorder %v3037_v10, %v3094_v19  ;;  %2339 = vmatprep.subr.bf16.mxu1 %v2486_v56 }
 0x113   : > { %vm851_vm8 = vmor %vm3284_vm12, %vm787_vm4  ;;  %vm328_vm12 = vcmp.eq.s32.totalorder %v3037_v10, %v3332_v39  ;;  %vm444_vm4 = vcmp.eq.s32.totalorder %v3037_v10, %v3021_v2 }
 0x114   : > { %vm2088_vm13 = vmpackc.low %vm851_vm8, %vm847_vm1  ;;  %vm616_vm1 = vcmp.eq.s32.totalorder %v3037_v10, %v3198_v29  ;;  %v3383_v44 = vpop.permute.xlu1 %746 }
 0x115   : > { %2089 = vmatmul.mubr.msk.bf16.gmra.mrb[4].mxu0 %vm2088_vm13, %v2659_v20  ;;  %vm673_vm11 = vmor %vm3300_vm7, %vm609_vm9  ;;  %vm620_vm9 = vcmp.eq.s32.totalorder %v3037_v10, %v3232_v31  ;;  %vm792_vm13 = vcmp.eq.s32.totalorder %v3037_v10, %v3003_v58  ;;  %2347 = vmatpush3.bf16.msra.mxu1 %v2486_v56 }
 0x116   : > { %vm677_vm15 = vmor %vm3294_vm5, %vm613_vm3 }
 0x117   : > { %vm849_vm2 = vmor %vm673_vm11, %vm785_vm14  ;;  %vm796_vm11 = vcmp.eq.s32.totalorder %v3037_v10, %v3290_v35 }
 0x118   : > { %vm853_vm7 = vmor %vm677_vm15, %vm789_vm6  ;;  %vm330_vm15 = vcmp.eq.s32.totalorder %v3043_v12, %v3332_v39 }
 0x119   : > { %vm2120_vm5 = vmpackc.low %vm853_vm7, %vm849_vm2  ;;  %vm442_vm2 = vcmp.eq.s32.totalorder %v3043_v12, %v3145_v25  ;;  %v3399_v46 = vpop.permute.xlu1 %288 }
 0x11a   : > { %2121 = vmatmul.mubr.msk.bf16.gmra.mrb[4].mxu1 %vm2120_vm5, %v2659_v20  ;;  %vm504_vm3 = vmor %vm328_vm12, %vm440_vm0  ;;  %vm446_vm12 = vcmp.eq.s32.totalorder %v3043_v12, %v3021_v2  ;;  %vm334_vm0 = vcmp.eq.s32.totalorder %v3043_v12, %v3094_v19  ;;  %vm622_vm5 = vcmp.eq.s32.totalorder %v3043_v12, %v3232_v31 }
 0x11b   : > { %vm508_vm8 = vmor %vm332_vm10, %vm444_vm4  ;;  %vm618_vm10 = vcmp.eq.s32.totalorder %v3043_v12, %v3198_v29 }
 0x11c   : > { %vm680_vm14 = vmor %vm504_vm3, %vm616_vm1 }
 0x11d   : > { %vm684_vm6 = vmor %vm508_vm8, %vm620_vm9  ;;  %vm794_vm8 = vcmp.eq.s32.totalorder %v3043_v12, %v3003_v58  ;;  %v3418_v48 = vpop.permute.xlu1 %291 }
 0x11e   : > { %vm856_vm7 = vmor %vm680_vm14, %vm792_vm13  ;;  %vm798_vm14 = vcmp.eq.s32.totalorder %v3043_v12, %v3290_v35 }
 0x11f   : > { %vm860_vm4 = vmor %vm684_vm6, %vm796_vm11  ;;  %vm327_vm6 = vcmp.eq.s32.totalorder %v3028_v7, %v3332_v39 }
 0x120   : > { %vm2090_vm1 = vmpackc.low %vm860_vm4, %vm856_vm7  ;;  %vm439_vm7 = vcmp.eq.s32.totalorder %v3028_v7, %v3145_v25 }
 0x121   : > { %2091 = vmatprep.mubr.msk.bf16.mxu0 %vm2090_vm1, %v2659_v20  ;;  %vm506_vm9 = vmor %vm330_vm15, %vm442_vm2  ;;  %vm443_vm15 = vcmp.eq.s32.totalorder %v3028_v7, %v3021_v2  ;;  %vm331_vm2 = vcmp.eq.s32.totalorder %v3028_v7, %v3094_v19  ;;  %vm619_vm1 = vcmp.eq.s32.totalorder %v3028_v7, %v3232_v31 }
 0x122   : > { %vm510_vm3 = vmor %vm334_vm0, %vm446_vm12  ;;  %vm615_vm0 = vcmp.eq.s32.totalorder %v3028_v7, %v3198_v29  ;;  %v3433_v50 = vpop.permute.xlu1 %403 }
 0x123   : > { %vm682_vm13 = vmor %vm506_vm9, %vm618_vm10 }
 0x124   : > { %vm686_vm11 = vmor %vm510_vm3, %vm622_vm5  ;;  %vm791_vm3 = vcmp.eq.s32.totalorder %v3028_v7, %v3003_v58 }
 0x125   : > { %vm858_vm4 = vmor %vm682_vm13, %vm794_vm8  ;;  %vm795_vm13 = vcmp.eq.s32.totalorder %v3028_v7, %v3290_v35 }
 0x126   : > { %vm862_vm12 = vmor %vm686_vm11, %vm798_vm14  ;;  %vm329_vm11 = vcmp.eq.s32.totalorder %v3189_v28, %v3332_v39 }
 0x127   : > { %vm2122_vm10 = vmpackc.low %vm862_vm12, %vm858_vm4  ;;  %vm441_vm4 = vcmp.eq.s32.totalorder %v3189_v28, %v3145_v25  ;;  %v3450_v51 = vpop.permute.xlu1 %576 }
 0x128   : > { %2123 = vmatprep.mubr.msk.bf16.mxu1 %vm2122_vm10, %v2659_v20  ;;  %vm503_vm5 = vmor %vm327_vm6, %vm439_vm7  ;;  %vm445_vm6 = vcmp.eq.s32.totalorder %v3189_v28, %v3021_v2  ;;  %vm333_vm7 = vcmp.eq.s32.totalorder %v3189_v28, %v3094_v19  ;;  %vm621_vm10 = vcmp.eq.s32.totalorder %v3189_v28, %v3232_v31  ;;  %v2487_v2 = vld [vmem:[#allocation2 + $0x18] sm:$0xff]  }
 0x129   : > { %vm507_vm9 = vmor %vm331_vm2, %vm443_vm15  ;;  %vm617_vm2 = vcmp.eq.s32.totalorder %v3189_v28, %v3198_v29  ;;  %2311 = vmatprep.subr.bf16.mxu0 %v2487_v2  ;;  %2340 = vmatprep.subr.bf16.mxu1 %v2487_v2  ;;  %v3821_v29 = vld [vmem:[%s4017_s2] ss:$0 sm:$0xff] }
 0x12a   : > { %vm679_vm8 = vmor %vm503_vm5, %vm615_vm0  ;;  %2312 = vmatpush3.bf16.msra.mxu0 %v2487_v2  ;;  %2348 = vmatpush3.bf16.msra.mxu1 %v2487_v2 }
 0x12b   : > { %vm683_vm14 = vmor %vm507_vm9, %vm619_vm1  ;;  %vm793_vm9 = vcmp.eq.s32.totalorder %v3189_v28, %v3003_v58  ;;  %v3513_v58 = vpop.permute.xlu0 %579  ;;  %2313 = vmatprep.subr.bf16.mxu0 %v2488_v3  ;;  %2341 = vmatprep.subr.bf16.mxu1 %v2488_v3 }
 0x12c   : > { %vm855_vm12 = vmor %vm679_vm8, %vm791_vm3  ;;  %vm797_vm8 = vcmp.eq.s32.totalorder %v3189_v28, %v3290_v35  ;;  %v3469_v52 = vpop.permute.xlu1 %752 }
 0x12d   : > { %vm859_vm15 = vmor %vm683_vm14, %vm795_vm13 }
 0x12e   : > { %vm2092_vm0 = vmpackc.low %vm859_vm15, %vm855_vm12  ;;  %vm448_vm12 = vcmp.eq.s32.totalorder %v3037_v10, %v3336_v40  ;;  %vm336_vm15 = vcmp.eq.s32.totalorder %v3037_v10, %v3317_v38  ;;  %2314 = vmatpush3.bf16.msra.mxu0 %v2488_v3  ;;  %2349 = vmatpush3.bf16.msra.mxu1 %v2488_v3 }
 0x12f   : > { %2093 = vmatmul.mubr.msk.bf16.gmra.mrb[8].mxu0 %vm2092_vm0, %v2659_v20  ;;  %vm505_vm1 = vmor %vm329_vm11, %vm441_vm4  ;;  %vm340_vm11 = vcmp.eq.s32.totalorder %v3037_v10, %v3376_v43  ;;  %vm628_vm0 = vcmp.eq.s32.totalorder %v3037_v10, %v3364_v42  ;;  %v3578_v63 = vpop.permute.xlu0 %588  ;;  %2315 = vmatprep.subr.bf16.mxu0 %v2489_v11 }
 0x130   : > { %vm509_vm5 = vmor %vm333_vm7, %vm445_vm6  ;;  %vm452_vm6 = vcmp.eq.s32.totalorder %v3037_v10, %v3353_v41  ;;  %v3486_v55 = vpop.permute.xlu1 %755  ;;  %2342 = vmatprep.subr.bf16.mxu1 %v2489_v11 }
 0x131   : > { %vm681_vm3 = vmor %vm505_vm1, %vm617_vm2  ;;  %vm624_vm2 = vcmp.eq.s32.totalorder %v3037_v10, %v3429_v49 }
 0x132   : > { %vm685_vm13 = vmor %vm509_vm5, %vm621_vm10  ;;  %vm800_vm5 = vcmp.eq.s32.totalorder %v3037_v10, %v3383_v44  ;;  %2316 = vmatpush3.bf16.msra.mxu0 %v2489_v11  ;;  %2350 = vmatpush3.bf16.msra.mxu1 %v2489_v11 }
 0x133   : > { %vm857_vm14 = vmor %vm681_vm3, %vm793_vm9  ;;  %vm804_vm3 = vcmp.eq.s32.totalorder %v3037_v10, %v3009_v60  ;;  %2317 = vmatprep.subr.bf16.mxu0 %v2490_v15  ;;  %2343 = vmatprep.subr.bf16.mxu1 %v2490_v15 }
 0x134   : > { %vm861_vm4 = vmor %vm685_vm13, %vm797_vm8  ;;  %vm450_vm13 = vcmp.eq.s32.totalorder %v3043_v12, %v3336_v40 }
 0x135   : > { %vm2124_vm7 = vmpackc.low %vm861_vm4, %vm857_vm14  ;;  %vm342_vm4 = vcmp.eq.s32.totalorder %v3043_v12, %v3376_v43  ;;  %v3503_v57 = vpop.permute.xlu1 %297 }
 0x136   : > { %2125 = vmatmul.mubr.msk.bf16.gmra.mrb[8].mxu1 %vm2124_vm7, %v2659_v20  ;;  %vm512_vm10 = vmor %vm336_vm15, %vm448_vm12  ;;  %vm454_vm12 = vcmp.eq.s32.totalorder %v3043_v12, %v3353_v41  ;;  %vm626_vm7 = vcmp.eq.s32.totalorder %v3043_v12, %v3429_v49  ;;  %2318 = vmatpush3.bf16.msra.mxu0 %v2490_v15 }
 0x137   : > { %vm516_vm1 = vmor %vm340_vm11, %vm452_vm6  ;;  %vm338_vm6 = vcmp.eq.s32.totalorder %v3043_v12, %v3317_v38  ;;  %2319 = vmatprep.subr.bf16.mxu0 %v2491_v16  ;;  %2351 = vmatpush3.bf16.msra.mxu1 %v2490_v15 }
 0x138   : > { %vm688_vm9 = vmor %vm512_vm10, %vm624_vm2  ;;  %vm630_vm2 = vcmp.eq.s32.totalorder %v3043_v12, %v3364_v42  ;;  %2344 = vmatprep.subr.bf16.mxu1 %v2491_v16 }
 0x139   : > { %vm692_vm8 = vmor %vm516_vm1, %vm628_vm0  ;;  %vm802_vm1 = vcmp.eq.s32.totalorder %v3043_v12, %v3383_v44 }
 0x13a   : > { %vm864_vm14 = vmor %vm688_vm9, %vm800_vm5  ;;  %vm806_vm9 = vcmp.eq.s32.totalorder %v3043_v12, %v3009_v60  ;;  %v3519_v59 = vpop.permute.xlu1 %406  ;;  %2320 = vmatpush3.bf16.msra.mxu0 %v2491_v16 }
 0x13b   : > { %vm868_vm11 = vmor %vm692_vm8, %vm804_vm3  ;;  %vm447_vm8 = vcmp.eq.s32.totalorder %v3028_v7, %v3336_v40  ;;  %2352 = vmatpush3.bf16.msra.mxu1 %v2491_v16 }
 0x13c   : > { %vm2094_vm15 = vmpackc.low %vm868_vm11, %vm864_vm14  ;;  %vm339_vm11 = vcmp.eq.s32.totalorder %v3028_v7, %v3376_v43 }
 0x13d   : > { %2095 = vmatprep.mubr.msk.bf16.mxu0 %vm2094_vm15, %v2659_v20  ;;  %vm514_vm0 = vmor %vm338_vm6, %vm450_vm13  ;;  %vm451_vm13 = vcmp.eq.s32.totalorder %v3028_v7, %v3353_v41  ;;  %vm623_vm6 = vcmp.eq.s32.totalorder %v3028_v7, %v3429_v49  ;;  %vm627_vm15 = vcmp.eq.s32.totalorder %v3028_v7, %v3364_v42 }
 0x13e   : > { %vm518_vm10 = vmor %vm342_vm4, %vm454_vm12  ;;  %vm335_vm12 = vcmp.eq.s32.totalorder %v3028_v7, %v3317_v38 }
 0x13f   : > { %vm690_vm5 = vmor %vm514_vm0, %vm626_vm7 }
 0x140   : > { %vm694_vm3 = vmor %vm518_vm10, %vm630_vm2  ;;  %vm799_vm10 = vcmp.eq.s32.totalorder %v3028_v7, %v3383_v44 }
 0x141   : > { %vm866_vm14 = vmor %vm690_vm5, %vm802_vm1  ;;  %vm803_vm5 = vcmp.eq.s32.totalorder %v3028_v7, %v3009_v60 }
 0x142   : > { %vm870_vm4 = vmor %vm694_vm3, %vm806_vm9  ;;  %vm449_vm3 = vcmp.eq.s32.totalorder %v3189_v28, %v3336_v40 }
 0x143   : > { %vm2126_vm7 = vmpackc.low %vm870_vm4, %vm866_vm14  ;;  %vm341_vm14 = vcmp.eq.s32.totalorder %v3189_v28, %v3376_v43  ;;  %vm337_vm4 = vcmp.eq.s32.totalorder %v3189_v28, %v3317_v38 }
 0x144   : > { %2127 = vmatprep.mubr.msk.bf16.mxu1 %vm2126_vm7, %v2659_v20  ;;  %vm511_vm2 = vmor %vm335_vm12, %vm447_vm8  ;;  %vm625_vm12 = vcmp.eq.s32.totalorder %v3189_v28, %v3429_v49  ;;  %vm629_vm7 = vcmp.eq.s32.totalorder %v3189_v28, %v3364_v42 }
 0x145   : > { %vm515_vm0 = vmor %vm339_vm11, %vm451_vm13  ;;  %vm453_vm11 = vcmp.eq.s32.totalorder %v3189_v28, %v3353_v41 }
 0x146   : > { %vm687_vm1 = vmor %vm511_vm2, %vm623_vm6 }
 0x147   : > { %vm691_vm9 = vmor %vm515_vm0, %vm627_vm15  ;;  %vm801_vm0 = vcmp.eq.s32.totalorder %v3189_v28, %v3383_v44 }
 0x148   : > { %vm863_vm8 = vmor %vm687_vm1, %vm799_vm10  ;;  %vm805_vm1 = vcmp.eq.s32.totalorder %v3189_v28, %v3009_v60  ;;  %v3536_v60 = vpop.permute.xlu1 %582 }
 0x149   : > { %vm867_vm13 = vmor %vm691_vm9, %vm803_vm5  ;;  %vm456_vm9 = vcmp.eq.s32.totalorder %v3037_v10, %v3026_v6 }
 0x14a   : > { %vm2096_vm6 = vmpackc.low %vm867_vm13, %vm863_vm8 }
 0x14b   : > { %2097 = vmatmul.mubr.msk.bf16.gmra.mrb[12].mxu0 %vm2096_vm6, %v2659_v20  ;;  %vm513_vm15 = vmor %vm337_vm4, %vm449_vm3  ;;  %vm344_vm3 = vcmp.eq.s32.totalorder %v3037_v10, %v3399_v46  ;;  %vm632_vm4 = vcmp.eq.s32.totalorder %v3037_v10, %v3450_v51  ;;  %vm636_vm6 = vcmp.eq.s32.totalorder %v3037_v10, %v3513_v58 }
 0x14c   : > { %vm517_vm2 = vmor %vm341_vm14, %vm453_vm11  ;;  %vm460_vm11 = vcmp.eq.s32.totalorder %v3037_v10, %v3433_v50  ;;  %v3553_v61 = vpop.permute.xlu1 %585 }
 0x14d   : > { %vm689_vm10 = vmor %vm513_vm15, %vm625_vm12  ;;  %vm348_vm12 = vcmp.eq.s32.totalorder %v3037_v10, %v3418_v48 }
 0x14e   : > { %vm693_vm5 = vmor %vm517_vm2, %vm629_vm7  ;;  %vm808_vm2 = vcmp.eq.s32.totalorder %v3037_v10, %v3469_v52 }
 0x14f   : > { %vm865_vm8 = vmor %vm689_vm10, %vm801_vm0  ;;  %vm812_vm10 = vcmp.eq.s32.totalorder %v3037_v10, %v3486_v55 }
 0x150   : > { %vm869_vm14 = vmor %vm693_vm5, %vm805_vm1  ;;  %vm458_vm5 = vcmp.eq.s32.totalorder %v3043_v12, %v3026_v6  ;;  %v3568_v62 = vpop.permute.xlu1 %761 }
 0x151   : > { %vm2128_vm13 = vmpackc.low %vm869_vm14, %vm865_vm8  ;;  %vm346_vm8 = vcmp.eq.s32.totalorder %v3043_v12, %v3399_v46 }
 0x152   : > { %2129 = vmatmul.mubr.msk.bf16.gmra.mrb[12].mxu1 %vm2128_vm13, %v2659_v20  ;;  %vm520_vm7 = vmor %vm344_vm3, %vm456_vm9  ;;  %vm462_vm13 = vcmp.eq.s32.totalorder %v3043_v12, %v3433_v50  ;;  %vm634_vm3 = vcmp.eq.s32.totalorder %v3043_v12, %v3450_v51 }
 0x153   : > { %vm524_vm15 = vmor %vm348_vm12, %vm460_vm11  ;;  %vm638_vm12 = vcmp.eq.s32.totalorder %v3043_v12, %v3513_v58 }
 0x154   : > { %vm696_vm0 = vmor %vm520_vm7, %vm632_vm4  ;;  %vm350_vm4 = vcmp.eq.s32.totalorder %v3043_v12, %v3418_v48  ;;  %v3589_v4 = vpop.permute.xlu1 %300 }
 0x155   : > { %vm700_vm1 = vmor %vm524_vm15, %vm636_vm6  ;;  %vm810_vm15 = vcmp.eq.s32.totalorder %v3043_v12, %v3469_v52 }
 0x156   : > { %vm872_vm14 = vmor %vm696_vm0, %vm808_vm2  ;;  %vm814_vm0 = vcmp.eq.s32.totalorder %v3043_v12, %v3486_v55 }
 0x157   : > { %vm876_vm9 = vmor %vm700_vm1, %vm812_vm10  ;;  %vm455_vm1 = vcmp.eq.s32.totalorder %v3028_v7, %v3026_v6 }
 0x158   : > { %vm2098_vm11 = vmpackc.low %vm876_vm9, %vm872_vm14  ;;  %vm343_vm14 = vcmp.eq.s32.totalorder %v3028_v7, %v3399_v46  ;;  %v3608_v8 = vpop.permute.xlu1 %412 }
 0x159   : > { %2099 = vmatprep.mubr.msk.bf16.mxu0 %vm2098_vm11, %v2659_v20  ;;  %vm522_vm6 = vmor %vm346_vm8, %vm458_vm5  ;;  %vm459_vm5 = vcmp.eq.s32.totalorder %v3028_v7, %v3433_v50  ;;  %vm347_vm11 = vcmp.eq.s32.totalorder %v3028_v7, %v3418_v48 }
 0x15a   : > { %vm526_vm7 = vmor %vm350_vm4, %vm462_vm13  ;;  %vm631_vm13 = vcmp.eq.s32.totalorder %v3028_v7, %v3450_v51  ;;  %vm635_vm4 = vcmp.eq.s32.totalorder %v3028_v7, %v3513_v58 }
 0x15b   : > { %vm698_vm2 = vmor %vm522_vm6, %vm634_vm3 }
 0x15c   : > { %vm702_vm10 = vmor %vm526_vm7, %vm638_vm12  ;;  %vm807_vm7 = vcmp.eq.s32.totalorder %v3028_v7, %v3469_v52  ;;  %v3625_v14 = vpop.permute.xlu1 %415 }
 0x15d   : > { %vm874_vm9 = vmor %vm698_vm2, %vm810_vm15  ;;  %vm811_vm2 = vcmp.eq.s32.totalorder %v3028_v7, %v3486_v55 }
 0x15e   : > { %vm878_vm8 = vmor %vm702_vm10, %vm814_vm0  ;;  %vm457_vm10 = vcmp.eq.s32.totalorder %v3189_v28, %v3026_v6  ;;  %v3597_v6 = vpop.permute.xlu0 %758 }
 0x15f   : > { %vm2130_vm3 = vmpackc.low %vm878_vm8, %vm874_vm9  ;;  %vm345_vm9 = vcmp.eq.s32.totalorder %v3189_v28, %v3399_v46 }
 0x160   : > { %2131 = vmatprep.mubr.msk.bf16.mxu1 %vm2130_vm3, %v2659_v20  ;;  %vm519_vm12 = vmor %vm343_vm14, %vm455_vm1  ;;  %vm461_vm1 = vcmp.eq.s32.totalorder %v3189_v28, %v3433_v50  ;;  %vm349_vm3 = vcmp.eq.s32.totalorder %v3189_v28, %v3418_v48  ;;  %v3639_v17 = vpop.permute.xlu1 %591 }
 0x161   : > { %vm523_vm6 = vmor %vm347_vm11, %vm459_vm5  ;;  %vm633_vm5 = vcmp.eq.s32.totalorder %v3189_v28, %v3450_v51  ;;  %vm637_vm11 = vcmp.eq.s32.totalorder %v3189_v28, %v3513_v58 }
 0x162   : > { %vm695_vm15 = vmor %vm519_vm12, %vm631_vm13  ;;  %v3685_v13 = vpop.permute.xlu0 %767 }
 0x163   : > { %vm699_vm0 = vmor %vm523_vm6, %vm635_vm4  ;;  %vm809_vm6 = vcmp.eq.s32.totalorder %v3189_v28, %v3469_v52 }
 0x164   : > { %vm871_vm8 = vmor %vm695_vm15, %vm807_vm7  ;;  %vm813_vm15 = vcmp.eq.s32.totalorder %v3189_v28, %v3486_v55  ;;  %v3662_v18 = vpop.permute.xlu1 %764 }
 0x165   : > { %vm875_vm14 = vmor %vm699_vm0, %vm811_vm2  ;;  %vm352_vm0 = vcmp.eq.s32.totalorder %v3037_v10, %v3395_v45 }
 0x166   : > { %vm2100_vm13 = vmpackc.low %vm875_vm14, %vm871_vm8  ;;  %v3748_v23 = vpop.permute.xlu0 %418 }
 0x167   : > { %2101 = vmatmul.mubr.msk.bf16.gmra.mrb[16].mxu0 %vm2100_vm13, %v2659_v20  ;;  %vm521_vm4 = vmor %vm345_vm9, %vm457_vm10  ;;  %vm464_vm9 = vcmp.eq.s32.totalorder %v3037_v10, %v3519_v59  ;;  %vm468_vm13 = vcmp.eq.s32.totalorder %v3037_v10, %v3034_v9 }
 0x168   : > { %vm525_vm12 = vmor %vm349_vm3, %vm461_vm1  ;;  %vm356_vm1 = vcmp.eq.s32.totalorder %v3037_v10, %v3503_v57  ;;  %vm644_vm3 = vcmp.eq.s32.totalorder %v3037_v10, %v3553_v61 }
 0x169   : > { %vm697_vm7 = vmor %vm521_vm4, %vm633_vm5  ;;  %vm640_vm5 = vcmp.eq.s32.totalorder %v3037_v10, %v3536_v60 }
 0x16a   : > { %vm701_vm2 = vmor %vm525_vm12, %vm637_vm11  ;;  %vm816_vm12 = vcmp.eq.s32.totalorder %v3037_v10, %v3597_v6  ;;  %v598_v25 = vpop.permute.xlu0 %597 }
 0x16b   : > { %vm873_vm10 = vmor %vm697_vm7, %vm809_vm6  ;;  %vm820_vm7 = vcmp.eq.s32.totalorder %v3037_v10, %v3568_v62 }
 0x16c   : > { %vm877_vm8 = vmor %vm701_vm2, %vm813_vm15  ;;  %vm354_vm2 = vcmp.eq.s32.totalorder %v3043_v12, %v3395_v45 }
 0x16d   : > { %vm2132_vm14 = vmpackc.low %vm877_vm8, %vm873_vm10  ;;  %vm466_vm10 = vcmp.eq.s32.totalorder %v3043_v12, %v3519_v59 }
 0x16e   : > { %2133 = vmatmul.mubr.msk.bf16.gmra.mrb[16].mxu1 %vm2132_vm14, %v2659_v20  ;;  %vm528_vm11 = vmor %vm352_vm0, %vm464_vm9  ;;  %vm358_vm0 = vcmp.eq.s32.totalorder %v3043_v12, %v3503_v57 }
 0x16f   : > { %vm532_vm4 = vmor %vm356_vm1, %vm468_vm13  ;;  %vm642_vm1 = vcmp.eq.s32.totalorder %v3043_v12, %v3536_v60  ;;  %vm646_vm13 = vcmp.eq.s32.totalorder %v3043_v12, %v3553_v61 }
 0x170   : > { %vm704_vm6 = vmor %vm528_vm11, %vm640_vm5  ;;  %vm470_vm5 = vcmp.eq.s32.totalorder %v3043_v12, %v3034_v9 }
 0x171   : > { %vm708_vm15 = vmor %vm532_vm4, %vm644_vm3  ;;  %vm818_vm4 = vcmp.eq.s32.totalorder %v3043_v12, %v3597_v6 }
 0x172   : > { %vm880_vm8 = vmor %vm704_vm6, %vm816_vm12  ;;  %vm822_vm6 = vcmp.eq.s32.totalorder %v3043_v12, %v3568_v62 }
 0x173   : > { %vm884_vm9 = vmor %vm708_vm15, %vm820_vm7  ;;  %vm351_vm15 = vcmp.eq.s32.totalorder %v3028_v7, %v3395_v45 }
 0x174   : > { %vm2102_vm14 = vmpackc.low %vm884_vm9, %vm880_vm8  ;;  %vm355_vm8 = vcmp.eq.s32.totalorder %v3028_v7, %v3503_v57  ;;  %vm639_vm9 = vcmp.eq.s32.totalorder %v3028_v7, %v3536_v60 }
 0x175   : > { %2103 = vmatprep.mubr.msk.bf16.mxu0 %vm2102_vm14, %v2659_v20  ;;  %vm530_vm3 = vmor %vm354_vm2, %vm466_vm10  ;;  %vm463_vm2 = vcmp.eq.s32.totalorder %v3028_v7, %v3519_v59  ;;  %vm467_vm14 = vcmp.eq.s32.totalorder %v3028_v7, %v3034_v9 }
 0x176   : > { %vm534_vm11 = vmor %vm358_vm0, %vm470_vm5  ;;  %vm643_vm5 = vcmp.eq.s32.totalorder %v3028_v7, %v3553_v61 }
 0x177   : > { %vm706_vm12 = vmor %vm530_vm3, %vm642_vm1 }
 0x178   : > { %vm710_vm7 = vmor %vm534_vm11, %vm646_vm13  ;;  %vm815_vm11 = vcmp.eq.s32.totalorder %v3028_v7, %v3597_v6 }
 0x179   : > { %vm882_vm10 = vmor %vm706_vm12, %vm818_vm4  ;;  %vm819_vm12 = vcmp.eq.s32.totalorder %v3028_v7, %v3568_v62 }
 0x17a   : > { %vm886_vm0 = vmor %vm710_vm7, %vm822_vm6  ;;  %vm353_vm7 = vcmp.eq.s32.totalorder %v3189_v28, %v3395_v45 }
 0x17b   : > { %vm2134_vm1 = vmpackc.low %vm886_vm0, %vm882_vm10  ;;  %vm465_vm10 = vcmp.eq.s32.totalorder %v3189_v28, %v3519_v59 }
 0x17c   : > { %2135 = vmatprep.mubr.msk.bf16.mxu1 %vm2134_vm1, %v2659_v20  ;;  %vm527_vm13 = vmor %vm351_vm15, %vm463_vm2  ;;  %vm357_vm15 = vcmp.eq.s32.totalorder %v3189_v28, %v3503_v57  ;;  %vm469_vm1 = vcmp.eq.s32.totalorder %v3189_v28, %v3034_v9  ;;  %v3677_v9 = vpop.permute.xlu1 %306 }
 0x17d   : > { %vm531_vm3 = vmor %vm355_vm8, %vm467_vm14  ;;  %vm641_vm8 = vcmp.eq.s32.totalorder %v3189_v28, %v3536_v60  ;;  %vm645_vm14 = vcmp.eq.s32.totalorder %v3189_v28, %v3553_v61 }
 0x17e   : > { %vm703_vm4 = vmor %vm527_vm13, %vm639_vm9 }
 0x17f   : > { %vm707_vm6 = vmor %vm531_vm3, %vm643_vm5  ;;  %vm817_vm3 = vcmp.eq.s32.totalorder %v3189_v28, %v3597_v6 }
 0x180   : > { %vm879_vm0 = vmor %vm703_vm4, %vm815_vm11  ;;  %vm821_vm4 = vcmp.eq.s32.totalorder %v3189_v28, %v3568_v62  ;;  %v3696_v19 = vpop.permute.xlu1 %309 }
 0x181   : > { %vm883_vm2 = vmor %vm707_vm6, %vm819_vm12 }
 0x182   : > { %vm2104_vm9 = vmpackc.low %vm883_vm2, %vm879_vm0  ;;  %vm472_vm0 = vcmp.eq.s32.totalorder %v3037_v10, %v3608_v8 }
 0x183   : > { %2105 = vmatmul.mubr.msk.bf16.gmra.mrb[20].mxu0 %vm2104_vm9, %v2659_v20  ;;  %vm529_vm5 = vmor %vm353_vm7, %vm465_vm10  ;;  %vm476_vm9 = vcmp.eq.s32.totalorder %v3037_v10, %v3625_v14  ;;  %vm648_vm7 = vcmp.eq.s32.totalorder %v3037_v10, %v3578_v63 }
 0x184   : > { %vm533_vm13 = vmor %vm357_vm15, %vm469_vm1  ;;  %vm360_vm15 = vcmp.eq.s32.totalorder %v3037_v10, %v3589_v4  ;;  %vm652_vm1 = vcmp.eq.s32.totalorder %v3037_v10, %v3639_v17  ;;  %v3715_v21 = vpop.permute.xlu1 %421 }
 0x185   : > { %vm705_vm11 = vmor %vm529_vm5, %vm641_vm8  ;;  %vm364_vm8 = vcmp.eq.s32.totalorder %v3037_v10, %v3412_v47 }
 0x186   : > { %vm709_vm12 = vmor %vm533_vm13, %vm645_vm14  ;;  %vm824_vm13 = vcmp.eq.s32.totalorder %v3037_v10, %v3662_v18 }
 0x187   : > { %vm881_vm6 = vmor %vm705_vm11, %vm817_vm3  ;;  %vm828_vm11 = vcmp.eq.s32.totalorder %v3037_v10, %v3685_v13 }
 0x188   : > { %vm885_vm2 = vmor %vm709_vm12, %vm821_vm4  ;;  %vm474_vm12 = vcmp.eq.s32.totalorder %v3043_v12, %v3608_v8  ;;  %v3732_v22 = vpop.permute.xlu1 %594 }
 0x189   : > { %vm2136_vm10 = vmpackc.low %vm885_vm2, %vm881_vm6  ;;  %vm478_vm2 = vcmp.eq.s32.totalorder %v3043_v12, %v3625_v14 }
 0x18a   : > { %2137 = vmatmul.mubr.msk.bf16.gmra.mrb[20].mxu1 %vm2136_vm10, %v2659_v20  ;;  %vm536_vm14 = vmor %vm360_vm15, %vm472_vm0  ;;  %vm650_vm0 = vcmp.eq.s32.totalorder %v3043_v12, %v3578_v63  ;;  %vm366_vm15 = vcmp.eq.s32.totalorder %v3043_v12, %v3412_v47 }
 0x18b   : > { %vm540_vm5 = vmor %vm364_vm8, %vm476_vm9  ;;  %vm362_vm9 = vcmp.eq.s32.totalorder %v3043_v12, %v3589_v4  ;;  %vm654_vm8 = vcmp.eq.s32.totalorder %v3043_v12, %v3639_v17 }
 0x18c   : > { %vm712_vm3 = vmor %vm536_vm14, %vm648_vm7  ;;  %v3751_v24 = vpop.permute.xlu1 %770 }
 0x18d   : > { %vm716_vm4 = vmor %vm540_vm5, %vm652_vm1  ;;  %vm826_vm5 = vcmp.eq.s32.totalorder %v3043_v12, %v3662_v18 }
 0x18e   : > { %vm888_vm6 = vmor %vm712_vm3, %vm824_vm13  ;;  %vm830_vm3 = vcmp.eq.s32.totalorder %v3043_v12, %v3685_v13 }
 0x18f   : > { %vm892_vm10 = vmor %vm716_vm4, %vm828_vm11  ;;  %vm471_vm4 = vcmp.eq.s32.totalorder %v3028_v7, %v3608_v8 }
 0x190   : > { %vm2106_vm7 = vmpackc.low %vm892_vm10, %vm888_vm6  ;;  %vm475_vm10 = vcmp.eq.s32.totalorder %v3028_v7, %v3625_v14  ;;  %v774_v26 = vpop.permute.xlu1 %773 }
 0x191   : > { %2107 = vmatprep.mubr.msk.bf16.mxu0 %vm2106_vm7, %v2659_v20  ;;  %vm538_vm1 = vmor %vm362_vm9, %vm474_vm12  ;;  %vm647_vm12 = vcmp.eq.s32.totalorder %v3028_v7, %v3578_v63  ;;  %vm363_vm9 = vcmp.eq.s32.totalorder %v3028_v7, %v3412_v47 }
 0x192   : > { %vm542_vm14 = vmor %vm366_vm15, %vm478_vm2  ;;  %vm359_vm2 = vcmp.eq.s32.totalorder %v3028_v7, %v3589_v4  ;;  %vm651_vm15 = vcmp.eq.s32.totalorder %v3028_v7, %v3639_v17 }
 0x193   : > { %vm714_vm13 = vmor %vm538_vm1, %vm650_vm0 }
 0x194   : > { %vm718_vm11 = vmor %vm542_vm14, %vm654_vm8  ;;  %vm823_vm14 = vcmp.eq.s32.totalorder %v3028_v7, %v3662_v18 }
 0x195   : > { %vm890_vm6 = vmor %vm714_vm13, %vm826_vm5  ;;  %vm827_vm13 = vcmp.eq.s32.totalorder %v3028_v7, %v3685_v13 }
 0x196   : > { %vm894_vm7 = vmor %vm718_vm11, %vm830_vm3  ;;  %vm473_vm11 = vcmp.eq.s32.totalorder %v3189_v28, %v3608_v8 }
 0x197   : > { %vm2138_vm0 = vmpackc.low %vm894_vm7, %vm890_vm6  ;;  %vm477_vm7 = vcmp.eq.s32.totalorder %v3189_v28, %v3625_v14 }
 0x198   : > { %2139 = vmatprep.mubr.msk.bf16.mxu1 %vm2138_vm0, %v2659_v20  ;;  %vm535_vm8 = vmor %vm359_vm2, %vm471_vm4  ;;  %vm649_vm4 = vcmp.eq.s32.totalorder %v3189_v28, %v3578_v63 }
 0x199   : > { %vm539_vm1 = vmor %vm363_vm9, %vm475_vm10  ;;  %vm361_vm10 = vcmp.eq.s32.totalorder %v3189_v28, %v3589_v4  ;;  %vm653_vm9 = vcmp.eq.s32.totalorder %v3189_v28, %v3639_v17 }
 0x19a   : > { %vm711_vm5 = vmor %vm535_vm8, %vm647_vm12  ;;  %vm365_vm12 = vcmp.eq.s32.totalorder %v3189_v28, %v3412_v47 }
 0x19b   : > { %vm715_vm3 = vmor %vm539_vm1, %vm651_vm15  ;;  %vm825_vm1 = vcmp.eq.s32.totalorder %v3189_v28, %v3662_v18 }
 0x19c   : > { %vm887_vm6 = vmor %vm711_vm5, %vm823_vm14  ;;  %vm829_vm5 = vcmp.eq.s32.totalorder %v3189_v28, %v3685_v13 }
 0x19d   : > { %vm891_vm0 = vmor %vm715_vm3, %vm827_vm13  ;;  %vm480_vm3 = vcmp.eq.s32.totalorder %v3037_v10, %v3748_v23 }
 0x19e   : > { %vm2108_vm2 = vmpackc.low %vm891_vm0, %vm887_vm6  ;;  %vm368_vm0 = vcmp.eq.s32.totalorder %v3037_v10, %v3677_v9 }
 0x19f   : > { %2109 = vmatmul.mubr.msk.bf16.gmra.mrb[24].mxu0 %vm2108_vm2, %v2659_v20  ;;  %vm537_vm15 = vmor %vm361_vm10, %vm473_vm11  ;;  %vm372_vm2 = vcmp.eq.s32.totalorder %v3037_v10, %v3696_v19 }
 0x1a0   : > { %vm541_vm8 = vmor %vm365_vm12, %vm477_vm7  ;;  %vm484_vm7 = vcmp.eq.s32.totalorder %v3037_v10, %v3715_v21  ;;  %vm660_vm12 = vcmp.eq.s32.totalorder %v3037_v10, %v598_v25 }
 0x1a1   : > { %vm713_vm14 = vmor %vm537_vm15, %vm649_vm4  ;;  %vm656_vm4 = vcmp.eq.s32.totalorder %v3037_v10, %v3732_v22 }
 0x1a2   : > { %vm717_vm13 = vmor %vm541_vm8, %vm653_vm9  ;;  %vm832_vm8 = vcmp.eq.s32.totalorder %v3037_v10, %v3751_v24 }
 0x1a3   : > { %vm889_vm6 = vmor %vm713_vm14, %vm825_vm1  ;;  %vm836_vm14 = vcmp.eq.s32.totalorder %v3037_v10, %v774_v26 }
 0x1a4   : > { %vm893_vm11 = vmor %vm717_vm13, %vm829_vm5  ;;  %vm482_vm13 = vcmp.eq.s32.totalorder %v3043_v12, %v3748_v23 }
 0x1a5   : > { %vm2140_vm10 = vmpackc.low %vm893_vm11, %vm889_vm6  ;;  %vm370_vm6 = vcmp.eq.s32.totalorder %v3043_v12, %v3677_v9 }
 0x1a6   : > { %2141 = vmatmul.mubr.msk.bf16.gmra.mrb[24].mxu1 %vm2140_vm10, %v2659_v20  ;;  %vm544_vm9 = vmor %vm368_vm0, %vm480_vm3  ;;  %vm486_vm10 = vcmp.eq.s32.totalorder %v3043_v12, %v3715_v21  ;;  %vm658_vm3 = vcmp.eq.s32.totalorder %v3043_v12, %v3732_v22 }
 0x1a7   : > { %vm548_vm15 = vmor %vm372_vm2, %vm484_vm7  ;;  %vm662_vm2 = vcmp.eq.s32.totalorder %v3043_v12, %v598_v25 }
 0x1a8   : > { %vm720_vm1 = vmor %vm544_vm9, %vm656_vm4  ;;  %vm374_vm4 = vcmp.eq.s32.totalorder %v3043_v12, %v3696_v19 }
 0x1a9   : > { %vm724_vm5 = vmor %vm548_vm15, %vm660_vm12  ;;  %vm834_vm15 = vcmp.eq.s32.totalorder %v3043_v12, %v3751_v24 }
 0x1aa   : > { %vm896_vm11 = vmor %vm720_vm1, %vm832_vm8  ;;  %vm838_vm1 = vcmp.eq.s32.totalorder %v3043_v12, %v774_v26 }
 0x1ab   : > { %vm900_vm0 = vmor %vm724_vm5, %vm836_vm14  ;;  %vm479_vm5 = vcmp.eq.s32.totalorder %v3028_v7, %v3748_v23 }
 0x1ac   : > { %vm2110_vm7 = vmpackc.low %vm900_vm0, %vm896_vm11  ;;  %vm367_vm11 = vcmp.eq.s32.totalorder %v3028_v7, %v3677_v9 }
 0x1ad   : > { %2111 = vmatprep.mubr.msk.bf16.mxu0 %vm2110_vm7, %v2659_v20  ;;  %vm546_vm12 = vmor %vm370_vm6, %vm482_vm13  ;;  %vm483_vm7 = vcmp.eq.s32.totalorder %v3028_v7, %v3715_v21  ;;  %vm655_vm13 = vcmp.eq.s32.totalorder %v3028_v7, %v3732_v22 }
 0x1ae   : > { %vm550_vm9 = vmor %vm374_vm4, %vm486_vm10  ;;  %vm659_vm4 = vcmp.eq.s32.totalorder %v3028_v7, %v598_v25 }
 0x1af   : > { %vm722_vm8 = vmor %vm546_vm12, %vm658_vm3  ;;  %vm371_vm3 = vcmp.eq.s32.totalorder %v3028_v7, %v3696_v19 }
 0x1b0   : > { %vm726_vm14 = vmor %vm550_vm9, %vm662_vm2  ;;  %vm831_vm9 = vcmp.eq.s32.totalorder %v3028_v7, %v3751_v24 }
 0x1b1   : > { %vm898_vm0 = vmor %vm722_vm8, %vm834_vm15  ;;  %vm835_vm8 = vcmp.eq.s32.totalorder %v3028_v7, %v774_v26 }
 0x1b2   : > { %vm902_vm6 = vmor %vm726_vm14, %vm838_vm1  ;;  %vm481_vm14 = vcmp.eq.s32.totalorder %v3189_v28, %v3748_v23 }
 0x1b3   : > { %vm2142_vm10 = vmpackc.low %vm902_vm6, %vm898_vm0  ;;  %vm369_vm0 = vcmp.eq.s32.totalorder %v3189_v28, %v3677_v9 }
 0x1b4   : > { %2143 = vmatprep.mubr.msk.bf16.mxu1 %vm2142_vm10, %v2659_v20  ;;  %vm543_vm2 = vmor %vm367_vm11, %vm479_vm5  ;;  %vm485_vm10 = vcmp.eq.s32.totalorder %v3189_v28, %v3715_v21  ;;  %vm657_vm11 = vcmp.eq.s32.totalorder %v3189_v28, %v3732_v22 }
 0x1b5   : > { %vm547_vm12 = vmor %vm371_vm3, %vm483_vm7  ;;  %vm661_vm3 = vcmp.eq.s32.totalorder %v3189_v28, %v598_v25 }
 0x1b6   : > { %vm719_vm15 = vmor %vm543_vm2, %vm655_vm13  ;;  %vm373_vm13 = vcmp.eq.s32.totalorder %v3189_v28, %v3696_v19 }
 0x1b7   : > { %vm723_vm1 = vmor %vm547_vm12, %vm659_vm4  ;;  %vm833_vm12 = vcmp.eq.s32.totalorder %v3189_v28, %v3751_v24 }
 0x1b8   : > { %vm895_vm6 = vmor %vm719_vm15, %vm831_vm9  ;;  %vm837_vm15 = vcmp.eq.s32.totalorder %v3189_v28, %v774_v26 }
 0x1b9   : > { %vm899_vm5 = vmor %vm723_vm1, %vm835_vm8 }
 0x1ba   : > { %vm2112_vm7 = vmpackc.low %vm899_vm5, %vm895_vm6 }
 0x1bb   : > { %2113 = vmatmul.mubr.msk.bf16.gmra.mrb[28].mxu0 %vm2112_vm7, %v2659_v20  ;;  %vm545_vm4 = vmor %vm369_vm0, %vm481_vm14 }
 0x1bc   : > { %vm549_vm2 = vmor %vm373_vm13, %vm485_vm10 }
 0x1bd   : > { %vm721_vm9 = vmor %vm545_vm4, %vm657_vm11 }
 0x1be   : > { %vm725_vm8 = vmor %vm549_vm2, %vm661_vm3 }
 0x1bf   : > { %vm897_vm1 = vmor %vm721_vm9, %vm833_vm12 }
 0x1c0   : > { %vm901_vm5 = vmor %vm725_vm8, %vm837_vm15 }
 0x1c1   : > { %vm2144_vm6 = vmpackc.low %vm901_vm5, %vm897_vm1 }
 0x1c2   : > { %2145 = vmatmul.mubr.msk.bf16.gmra.mrb[28].mxu1 %vm2144_vm6, %v2659_v20 }
 0x1d2   : > { %v2177_v7 = vpop.f32.mrb[0].mxu0 }
 0x1d3   : > { %v2178_v10 = vpop.f32.mrb[1].mxu0 }
 0x1d4   : > { %v2179_v12 = vadd.f32 %v2178_v10, %v2177_v7  ;;  %v2180_v1 = vpop.f32.mrb[2].mxu0 }
 0x1d5   : > { %v2181_v27 = vpop.f32.mrb[3].mxu0 }
 0x1d6   : > { %v2182_v0 = vadd.f32 %v2181_v27, %v2180_v1  ;;  %v1361_v28 = vadd.f32 %v2179_v12, %v3821_v29 }
 0x1d8   : > { %v1364_v5 = vadd.f32 %v2182_v0, %v3821_v29 }
 0x1df   : > { %v2241_v30 = vpop.f32.mrb[0].mxu1 }
 0x1e0   : > { %v2242_v31 = vpop.f32.mrb[1].mxu1 }
 0x1e1   : > { %v2243_v32 = vadd.f32 %v2242_v31, %v2241_v30  ;;  %v2244_v33 = vpop.f32.mrb[2].mxu1 }
 0x1e2   : > { %v2245_v20 = vpop.f32.mrb[3].mxu1 }
 0x1e3   : > { %v1458_v34 = vadd.f32 %v2243_v32, %v1361_v28  ;;  %v2246_v35 = vadd.f32 %v2245_v20, %v2244_v33 }
 0x1e5   : > { %v1461_v36 = vadd.f32 %v2246_v35, %v1364_v5  ;;  %v1520_v37 = vmax.f32 %v1458_v34, 0.0 }
 0x1e7   : > { %v1521_v38 = vmax.f32 %v1461_v36, 0.0 }
 0x1e8   : > { %v2183_v39 = vpop.f32.mrb[4].mxu0 }
 0x1e9   : > { %v2184_v40 = vpop.f32.mrb[5].mxu0  ;;  %v1536_v43 = vpack.c.bf16 %v1521_v38, %v1520_v37 }
 0x1ea   : > { %v2185_v41 = vadd.f32 %v2184_v40, %v2183_v39  ;;  %v2186_v42 = vpop.f32.mrb[6].mxu0 }
 0x1eb   : > { %v2187_v44 = vpop.f32.mrb[7].mxu0  ;;  %2321 = vmatprep.mubr.bf16.mxu0 %v1536_v43 }
 0x1ec   : > { %v2188_v45 = vadd.f32 %v2187_v44, %v2186_v42  ;;  %v1369_v47 = vadd.f32 %v2185_v41, %v3821_v29 }
 0x1ed   : > { %v2247_v46 = vpop.f32.mrb[4].mxu1 }
 0x1ee   : > { %v2248_v48 = vpop.f32.mrb[5].mxu1  ;;  %v1372_v51 = vadd.f32 %v2188_v45, %v3821_v29 }
 0x1ef   : > { %v2249_v49 = vadd.f32 %v2248_v48, %v2247_v46  ;;  %v2250_v50 = vpop.f32.mrb[6].mxu1 }
 0x1f0   : > { %v2251_v52 = vpop.f32.mrb[7].mxu1 }
 0x1f1   : > { %v1466_v53 = vadd.f32 %v2249_v49, %v1369_v47  ;;  %v2252_v54 = vadd.f32 %v2251_v52, %v2250_v50 }
 0x1f3   : > { %v1469_v55 = vadd.f32 %v2252_v54, %v1372_v51  ;;  %v1522_v56 = vmax.f32 %v1466_v53, 0.0 }
 0x1f5   : > { %v1523_v57 = vmax.f32 %v1469_v55, 0.0 }
 0x1f7   : > { %v1537_v58 = vpack.c.bf16 %v1523_v57, %v1522_v56 }
 0x1f9   : > { %2322 = vmatmul.mubr.bf16.vlgmr.msra.gmra.mrb[32].mxu0 %v1537_v58 }
 0x202   : > { %v2189_v59 = vpop.f32.mrb[8].mxu0 }
 0x203   : > { %v2190_v60 = vpop.f32.mrb[9].mxu0 }
 0x204   : > { %v2191_v61 = vadd.f32 %v2190_v60, %v2189_v59  ;;  %v2192_v62 = vpop.f32.mrb[10].mxu0 }
 0x205   : > { %v2193_v63 = vpop.f32.mrb[11].mxu0 }
 0x206   : > { %v2194_v2 = vadd.f32 %v2193_v63, %v2192_v62  ;;  %v1377_v4 = vadd.f32 %v2191_v61, %v3821_v29 }
 0x208   : > { %v1380_v14 = vadd.f32 %v2194_v2, %v3821_v29 }
 0x209   : > { %v2253_v3 = vpop.f32.mrb[8].mxu1 }
 0x20a   : > { %v2254_v6 = vpop.f32.mrb[9].mxu1 }
 0x20b   : > { %v2255_v8 = vadd.f32 %v2254_v6, %v2253_v3  ;;  %v2256_v11 = vpop.f32.mrb[10].mxu1 }
 0x20c   : > { %v2257_v15 = vpop.f32.mrb[11].mxu1 }
 0x20d   : > { %v1474_v16 = vadd.f32 %v2255_v8, %v1377_v4  ;;  %v2258_v17 = vadd.f32 %v2257_v15, %v2256_v11 }
 0x20f   : > { %v1477_v18 = vadd.f32 %v2258_v17, %v1380_v14  ;;  %v1524_v9 = vmax.f32 %v1474_v16, 0.0 }
 0x211   : > { %v1525_v13 = vmax.f32 %v1477_v18, 0.0 }
 0x213   : > { %v1538_v19 = vpack.c.bf16 %v1525_v13, %v1524_v9 }
 0x215   : > { %2325 = vmatprep.mubr.bf16.mxu0 %v1538_v19 }
 0x21e   : > { %v2195_v21 = vpop.f32.mrb[12].mxu0 }
 0x21f   : > { %v2196_v22 = vpop.f32.mrb[13].mxu0 }
 0x220   : > { %v2197_v23 = vadd.f32 %v2196_v22, %v2195_v21  ;;  %v2198_v24 = vpop.f32.mrb[14].mxu0 }
 0x221   : > { %v2199_v25 = vpop.f32.mrb[15].mxu0 }
 0x222   : > { %v2200_v26 = vadd.f32 %v2199_v25, %v2198_v24  ;;  %v1385_v10 = vadd.f32 %v2197_v23, %v3821_v29 }
 0x224   : > { %v1388_v0 = vadd.f32 %v2200_v26, %v3821_v29 }
 0x225   : > { %v2259_v7 = vpop.f32.mrb[12].mxu1 }
 0x226   : > { %v2260_v12 = vpop.f32.mrb[13].mxu1 }
 0x227   : > { %v2261_v1 = vadd.f32 %v2260_v12, %v2259_v7  ;;  %v2262_v27 = vpop.f32.mrb[14].mxu1 }
 0x228   : > { %v2263_v30 = vpop.f32.mrb[15].mxu1 }
 0x229   : > { %v1482_v28 = vadd.f32 %v2261_v1, %v1385_v10  ;;  %v2264_v31 = vadd.f32 %v2263_v30, %v2262_v27 }
 0x22b   : > { %v1485_v32 = vadd.f32 %v2264_v31, %v1388_v0  ;;  %v1526_v33 = vmax.f32 %v1482_v28, 0.0 }
 0x22d   : > { %v1527_v5 = vmax.f32 %v1485_v32, 0.0 }
 0x22f   : > { %v1539_v20 = vpack.c.bf16 %v1527_v5, %v1526_v33 }
 0x231   : > { %2326 = vmatmul.mubr.bf16.gmra.mrb[36].mxu0 %v1539_v20 }
 0x23a   : > { %v2201_v34 = vpop.f32.mrb[16].mxu0 }
 0x23b   : > { %v2202_v35 = vpop.f32.mrb[17].mxu0 }
 0x23c   : > { %v2203_v36 = vadd.f32 %v2202_v35, %v2201_v34  ;;  %v2204_v37 = vpop.f32.mrb[18].mxu0 }
 0x23d   : > { %v2205_v38 = vpop.f32.mrb[19].mxu0 }
 0x23e   : > { %v2206_v39 = vadd.f32 %v2205_v38, %v2204_v37  ;;  %v1393_v41 = vadd.f32 %v2203_v36, %v3821_v29 }
 0x240   : > { %v1396_v45 = vadd.f32 %v2206_v39, %v3821_v29 }
 0x241   : > { %v2265_v40 = vpop.f32.mrb[16].mxu1 }
 0x242   : > { %v2266_v42 = vpop.f32.mrb[17].mxu1 }
 0x243   : > { %v2267_v43 = vadd.f32 %v2266_v42, %v2265_v40  ;;  %v2268_v44 = vpop.f32.mrb[18].mxu1 }
 0x244   : > { %v2269_v46 = vpop.f32.mrb[19].mxu1 }
 0x245   : > { %v1490_v47 = vadd.f32 %v2267_v43, %v1393_v41  ;;  %v2270_v48 = vadd.f32 %v2269_v46, %v2268_v44 }
 0x247   : > { %v1493_v49 = vadd.f32 %v2270_v48, %v1396_v45  ;;  %v1528_v50 = vmax.f32 %v1490_v47, 0.0  ;;  %v2146_v47 = vld [vmem:[%s4019_s4] ss:$0 sm:$0xff] }
 0x249   : > { %v1529_v51 = vmax.f32 %v1493_v49, 0.0 }
 0x24b   : > { %v1540_v52 = vpack.c.bf16 %v1529_v51, %v1528_v50 }
 0x24d   : > { %2329 = vmatprep.mubr.bf16.mxu1 %v1540_v52 }
 0x256   : > { %v2207_v53 = vpop.f32.mrb[20].mxu0 }
 0x257   : > { %v2208_v54 = vpop.f32.mrb[21].mxu0 }
 0x258   : > { %v2209_v55 = vadd.f32 %v2208_v54, %v2207_v53  ;;  %v2210_v56 = vpop.f32.mrb[22].mxu0 }
 0x259   : > { %v2211_v57 = vpop.f32.mrb[23].mxu0 }
 0x25a   : > { %v2212_v58 = vadd.f32 %v2211_v57, %v2210_v56  ;;  %v1401_v60 = vadd.f32 %v2209_v55, %v3821_v29 }
 0x25c   : > { %v1404_v2 = vadd.f32 %v2212_v58, %v3821_v29 }
 0x25d   : > { %v2271_v59 = vpop.f32.mrb[20].mxu1 }
 0x25e   : > { %v2272_v61 = vpop.f32.mrb[21].mxu1 }
 0x25f   : > { %v2273_v62 = vadd.f32 %v2272_v61, %v2271_v59  ;;  %v2274_v63 = vpop.f32.mrb[22].mxu1 }
 0x260   : > { %v2275_v3 = vpop.f32.mrb[23].mxu1 }
 0x261   : > { %v1498_v4 = vadd.f32 %v2273_v62, %v1401_v60  ;;  %v2276_v6 = vadd.f32 %v2275_v3, %v2274_v63 }
 0x263   : > { %v1501_v8 = vadd.f32 %v2276_v6, %v1404_v2  ;;  %v1530_v11 = vmax.f32 %v1498_v4, 0.0 }
 0x265   : > { %v1531_v14 = vmax.f32 %v1501_v8, 0.0 }
 0x267   : > { %v1541_v15 = vpack.c.bf16 %v1531_v14, %v1530_v11 }
 0x269   : > { %2330 = vmatmul.mubr.bf16.vlgmr.msra.gmra.mrb[32].mxu1 %v1541_v15 }
 0x272   : > { %v2213_v16 = vpop.f32.mrb[24].mxu0 }
 0x273   : > { %v2214_v17 = vpop.f32.mrb[25].mxu0 }
 0x274   : > { %v2215_v18 = vadd.f32 %v2214_v17, %v2213_v16  ;;  %v2216_v9 = vpop.f32.mrb[26].mxu0 }
 0x275   : > { %v2217_v13 = vpop.f32.mrb[27].mxu0 }
 0x276   : > { %v2218_v19 = vadd.f32 %v2217_v13, %v2216_v9  ;;  %v1409_v22 = vadd.f32 %v2215_v18, %v3821_v29 }
 0x278   : > { %v1412_v26 = vadd.f32 %v2218_v19, %v3821_v29 }
 0x279   : > { %v2277_v21 = vpop.f32.mrb[24].mxu1 }
 0x27a   : > { %v2278_v23 = vpop.f32.mrb[25].mxu1 }
 0x27b   : > { %v2279_v24 = vadd.f32 %v2278_v23, %v2277_v21  ;;  %v2280_v25 = vpop.f32.mrb[26].mxu1 }
 0x27c   : > { %v2281_v7 = vpop.f32.mrb[27].mxu1 }
 0x27d   : > { %v1506_v10 = vadd.f32 %v2279_v24, %v1409_v22  ;;  %v2282_v12 = vadd.f32 %v2281_v7, %v2280_v25 }
 0x27f   : > { %v1509_v1 = vadd.f32 %v2282_v12, %v1412_v26  ;;  %v1532_v27 = vmax.f32 %v1506_v10, 0.0 }
 0x281   : > { %v1533_v0 = vmax.f32 %v1509_v1, 0.0 }
 0x283   : > { %v1542_v30 = vpack.c.bf16 %v1533_v0, %v1532_v27 }
 0x285   : > { %2333 = vmatprep.mubr.bf16.mxu1 %v1542_v30 }
 0x28e   : > { %v2219_v28 = vpop.f32.mrb[28].mxu0 }
 0x28f   : > { %v2220_v31 = vpop.f32.mrb[29].mxu0 }
 0x290   : > { %v2221_v32 = vadd.f32 %v2220_v31, %v2219_v28  ;;  %v2222_v33 = vpop.f32.mrb[30].mxu0 }
 0x291   : > { %v2223_v5 = vpop.f32.mrb[31].mxu0 }
 0x292   : > { %v2224_v20 = vadd.f32 %v2223_v5, %v2222_v33  ;;  %v1417_v35 = vadd.f32 %v2221_v32, %v3821_v29 }
 0x294   : > { %v1420_v39 = vadd.f32 %v2224_v20, %v3821_v29 }
 0x295   : > { %v2283_v34 = vpop.f32.mrb[28].mxu1 }
 0x296   : > { %v2284_v36 = vpop.f32.mrb[29].mxu1 }
 0x297   : > { %v2285_v37 = vadd.f32 %v2284_v36, %v2283_v34  ;;  %v2286_v38 = vpop.f32.mrb[30].mxu1 }
 0x298   : > { %v2287_v40 = vpop.f32.mrb[31].mxu1 }
 0x299   : > { %v1514_v41 = vadd.f32 %v2285_v37, %v1417_v35  ;;  %v2288_v42 = vadd.f32 %v2287_v40, %v2286_v38 }
 0x29b   : > { %v1517_v43 = vadd.f32 %v2288_v42, %v1420_v39  ;;  %v1534_v44 = vmax.f32 %v1514_v41, 0.0 }
 0x29d   : > { %v1535_v45 = vmax.f32 %v1517_v43, 0.0 }
 0x29f   : > { %v1543_v46 = vpack.c.bf16 %v1535_v45, %v1534_v44 }
 0x2a1   : > { %2334 = vmatmul.mubr.bf16.gmra.mrb[36].mxu1 %v1543_v46 }
 0x2cc   : > { %v2323_v48 = vpop.f32.mrb[32].mxu0 }
 0x2cd   : > { %v1658_v49 = vadd.f32 %v2323_v48, %v2146_v47  ;;  %v1649_v50 = vpop.f32.mrb[33].mxu0 }
 0x2ce   : > { %v2324_v51 = vpop.f32.mrb[34].mxu0  ;;  %v1650_v29 = vadd.f32 %v2146_v47, %v1649_v50 }
 0x2cf   : > { %1716 = vmax.xlane.f32.xlu0 %v1658_v49  ;;  %v1652_v52 = vpop.f32.mrb[35].mxu0  ;;  %v1661_v54 = vadd.f32 %v2324_v51, %v2146_v47 }
 0x2d0   : > { %v1653_v53 = vadd.f32 %v2146_v47, %v1652_v52 }
 0x2d2   : > { %1714 = vmax.xlane.f32.xlu1 %v1653_v53 }
 0x2d3   : > { %1712 = vmax.xlane.f32.xlu0 %v1650_v29 }
 0x2d7   : > { %1718 = vmax.xlane.f32.xlu0 %v1661_v54 }
 0x304   : > { %v2327_v55 = vpop.f32.mrb[36].mxu0 }
 0x305   : > { %v1674_v56 = vadd.f32 %v2327_v55, %v2146_v47  ;;  %v1665_v57 = vpop.f32.mrb[37].mxu0 }
 0x306   : > { %v2328_v58 = vpop.f32.mrb[38].mxu0  ;;  %v1666_v61 = vadd.f32 %v2146_v47, %v1665_v57 }
 0x307   : > { %v1677_v59 = vadd.f32 %v2328_v58, %v2146_v47  ;;  %v1668_v60 = vpop.f32.mrb[39].mxu0  ;;  %1724 = vmax.xlane.f32.xlu1 %v1674_v56 }
 0x308   : > { %v3842_v62 = vadd.f32 %v2146_v47, %v1668_v60 }
 0x309   : > { %1726 = vmax.xlane.f32.xlu0 %v1677_v59 }
 0x30b   : > { %1720 = vmax.xlane.f32.xlu1 %v1666_v61 }
 0x30d   : > { %1722 = vmax.xlane.f32.xlu0 %v3842_v62 }
 0x33c   : > { %v2331_v63 = vpop.f32.mrb[32].mxu1 }
 0x33d   : > { %v3845_v2 = vadd.f32 %v2331_v63, %v2146_v47  ;;  %v1681_v3 = vpop.f32.mrb[33].mxu1 }
 0x33e   : > { %v2332_v4 = vpop.f32.mrb[34].mxu1  ;;  %v3850_v11 = vadd.f32 %v2146_v47, %v1681_v3 }
 0x33f   : > { %v3847_v6 = vadd.f32 %v2332_v4, %v2146_v47  ;;  %v1684_v8 = vpop.f32.mrb[35].mxu1  ;;  %1732 = vmax.xlane.f32.xlu1 %v3845_v2 }
 0x340   : > { %v3853_v14 = vadd.f32 %v2146_v47, %v1684_v8 }
 0x341   : > { %1734 = vmax.xlane.f32.xlu0 %v3847_v6 }
 0x343   : > { %1728 = vmax.xlane.f32.xlu1 %v3850_v11 }
 0x345   : > { %1730 = vmax.xlane.f32.xlu0 %v3853_v14 }
 0x35c   : > { %v1717_v15 = vpop.xlane.xlu0 %1716 }
 0x35d   : > { %v3857_v18 = vsub.f32 %v1658_v49, %v1717_v15 }
 0x35f   : > { %v1764_v13 = vmul.f32 1.442695, %v3857_v18  ;;  %v1715_v21 = vpop.xlane.xlu1 %1714 }
 0x360   : > { %v1713_v16 = vpop.xlane.xlu0 %1712  ;;  %v3865_v23 = vsub.f32 %v1653_v53, %v1715_v21 }
 0x361   : > { %v3862_v19 = vsub.f32 %v1650_v29, %v1713_v16  ;;  %2492 = vpow2.f32 %v1764_v13 }
 0x362   : > { %v1762_v1 = vmul.f32 1.442695, %v3865_v23 }
 0x363   : > { %v1760_v24 = vmul.f32 1.442695, %v3862_v19 }
 0x364   : > { %v1719_v17 = vpop.xlane.xlu0 %1718 }
 0x365   : > { %v3859_v9 = vsub.f32 %v1661_v54, %v1719_v17 }
 0x367   : > { %v1766_v22 = vmul.f32 1.442695, %v3859_v9 }
 0x369   : > { %2494 = vpow2.f32 %v1766_v22 }
 0x36a   : > { %2496 = vpow2.f32 %v1760_v24 }
 0x36b   : > { %2498 = vpow2.f32 %v1762_v1  ;;  %v2493_v28 = vpop.eup %2492 }
 0x373   : > { %v2495_v31 = vpop.eup %2494 }
 0x374   : > { %v2335_v25 = vpop.f32.mrb[36].mxu1  ;;  %v2497_v32 = vpop.eup %2496 }
 0x375   : > { %v1697_v26 = vpop.f32.mrb[37].mxu1  ;;  %v3874_v0 = vadd.f32 %v2335_v25, %v2146_v47  ;;  %v2499_v33 = vpop.eup %2498 }
 0x376   : > { %v3868_v7 = vadd.f32 %v2146_v47, %v1697_v26  ;;  %v2336_v10 = vpop.f32.mrb[38].mxu1 }
 0x377   : > { %v1700_v12 = vpop.f32.mrb[39].mxu1  ;;  %v3877_v30 = vadd.f32 %v2336_v10, %v2146_v47 }
 0x378   : > { %v3871_v27 = vadd.f32 %v2146_v47, %v1700_v12  ;;  %1736 = vmax.xlane.f32.xlu1 %v3868_v7 }
 0x37a   : > { %1738 = vmax.xlane.f32.xlu0 %v3871_v27 }
 0x37c   : > { %1740 = vmax.xlane.f32.xlu1 %v3874_v0 }
 0x37e   : > { %1742 = vmax.xlane.f32.xlu0 %v3877_v30 }
 0x380   : > { %1796 = vadd.xlane.f32.xlu1 %v2493_v28 }
 0x382   : > { %1798 = vadd.xlane.f32.xlu0 %v2495_v31 }
 0x384   : > { %1792 = vadd.xlane.f32.xlu1 %v2497_v32 }
 0x386   : > { %1794 = vadd.xlane.f32.xlu0 %v2499_v33 }
 0x394   : > { %v1725_v5 = vpop.xlane.xlu1 %1724 }
 0x395   : > { %v3881_v20 = vsub.f32 %v1674_v56, %v1725_v5 }
 0x396   : > { %v1727_v34 = vpop.xlane.xlu0 %1726 }
 0x397   : > { %v1772_v35 = vmul.f32 1.442695, %v3881_v20  ;;  %v3884_v36 = vsub.f32 %v1677_v59, %v1727_v34 }
 0x398   : > { %v1721_v37 = vpop.xlane.xlu1 %1720 }
 0x399   : > { %2500 = vpow2.f32 %v1772_v35  ;;  %v1774_v38 = vmul.f32 1.442695, %v3884_v36  ;;  %v3887_v39 = vsub.f32 %v1666_v61, %v1721_v37 }
 0x39a   : > { %v1723_v40 = vpop.xlane.xlu0 %1722 }
 0x39b   : > { %2502 = vpow2.f32 %v1774_v38  ;;  %v1768_v41 = vmul.f32 1.442695, %v3887_v39  ;;  %v3891_v42 = vsub.f32 %v3842_v62, %v1723_v40 }
 0x39d   : > { %2504 = vpow2.f32 %v1768_v41  ;;  %v1770_v43 = vmul.f32 1.442695, %v3891_v42 }
 0x39f   : > { %2506 = vpow2.f32 %v1770_v43 }
 0x3a3   : > { %v2501_v44 = vpop.eup %2500 }
 0x3a4   : > { %1804 = vadd.xlane.f32.xlu1 %v2501_v44 }
 0x3a5   : > { %v2503_v45 = vpop.eup %2502 }
 0x3a6   : > { %1806 = vadd.xlane.f32.xlu0 %v2503_v45 }
 0x3a7   : > { %v2505_v46 = vpop.eup %2504 }
 0x3a8   : > { %1800 = vadd.xlane.f32.xlu1 %v2505_v46 }
 0x3a9   : > { %v2507_v47 = vpop.eup %2506 }
 0x3aa   : > { %1802 = vadd.xlane.f32.xlu0 %v2507_v47 }
 0x3cc   : > { %v1733_v48 = vpop.xlane.xlu1 %1732 }
 0x3cd   : > { %v3895_v49 = vsub.f32 %v3845_v2, %v1733_v48 }
 0x3ce   : > { %v1735_v50 = vpop.xlane.xlu0 %1734 }
 0x3cf   : > { %v1780_v51 = vmul.f32 1.442695, %v3895_v49  ;;  %v3899_v52 = vsub.f32 %v3847_v6, %v1735_v50 }
 0x3d0   : > { %v1729_v53 = vpop.xlane.xlu1 %1728 }
 0x3d1   : > { %2508 = vpow2.f32 %v1780_v51  ;;  %v1782_v29 = vmul.f32 1.442695, %v3899_v52  ;;  %v3903_v54 = vsub.f32 %v3850_v11, %v1729_v53 }
 0x3d2   : > { %v1731_v55 = vpop.xlane.xlu0 %1730 }
 0x3d3   : > { %2510 = vpow2.f32 %v1782_v29  ;;  %v1776_v56 = vmul.f32 1.442695, %v3903_v54  ;;  %v3907_v57 = vsub.f32 %v3853_v14, %v1731_v55 }
 0x3d5   : > { %2512 = vpow2.f32 %v1776_v56  ;;  %v1778_v58 = vmul.f32 1.442695, %v3907_v57 }
 0x3d7   : > { %2514 = vpow2.f32 %v1778_v58 }
 0x3db   : > { %v2509_v59 = vpop.eup %2508 }
 0x3dc   : > { %1812 = vadd.xlane.f32.xlu1 %v2509_v59 }
 0x3dd   : > { %v2511_v60 = vpop.eup %2510 }
 0x3de   : > { %1814 = vadd.xlane.f32.xlu0 %v2511_v60 }
 0x3df   : > { %v2513_v61 = vpop.eup %2512 }
 0x3e0   : > { %1808 = vadd.xlane.f32.xlu1 %v2513_v61 }
 0x3e1   : > { %v2515_v62 = vpop.eup %2514 }
 0x3e2   : > { %1810 = vadd.xlane.f32.xlu0 %v2515_v62 }
 0x405   : > { %v1737_v63 = vpop.xlane.xlu1 %1736 }
 0x406   : > { %v3911_v2 = vsub.f32 %v3868_v7, %v1737_v63 }
 0x407   : > { %v1739_v3 = vpop.xlane.xlu0 %1738 }
 0x408   : > { %v1784_v4 = vmul.f32 1.442695, %v3911_v2  ;;  %v3915_v6 = vsub.f32 %v3871_v27, %v1739_v3 }
 0x409   : > { %v1741_v8 = vpop.xlane.xlu1 %1740 }
 0x40a   : > { %2516 = vpow2.f32 %v1784_v4  ;;  %v1786_v11 = vmul.f32 1.442695, %v3915_v6  ;;  %v3919_v14 = vsub.f32 %v3874_v0, %v1741_v8 }
 0x40b   : > { %v1743_v15 = vpop.xlane.xlu0 %1742 }
 0x40c   : > { %2518 = vpow2.f32 %v1786_v11  ;;  %v1788_v16 = vmul.f32 1.442695, %v3919_v14  ;;  %v3923_v17 = vsub.f32 %v3877_v30, %v1743_v15 }
 0x40d   : > { %v1797_v13 = vpop.xlane.xlu1 %1796 }
 0x40e   : > { %2520 = vpow2.f32 %v1788_v16  ;;  %v1790_v21 = vmul.f32 1.442695, %v3923_v17 }
 0x40f   : > { %2522 = vlog2.f32 %v1797_v13  ;;  %v1799_v22 = vpop.xlane.xlu0 %1798 }
 0x410   : > { %2524 = vpow2.f32 %v1790_v21 }
 0x411   : > { %v1793_v24 = vpop.xlane.xlu1 %1792  ;;  %2526 = vlog2.f32 %v1799_v22 }
 0x412   : > { %2528 = vlog2.f32 %v1793_v24 }
 0x413   : > { %v1795_v25 = vpop.xlane.xlu0 %1794 }
 0x414   : > { %v2517_v26 = vpop.eup %2516  ;;  %2530 = vlog2.f32 %v1795_v25 }
 0x415   : > { %1816 = vadd.xlane.f32.xlu1 %v2517_v26 }
 0x416   : > { %v2519_v7 = vpop.eup %2518 }
 0x417   : > { %1818 = vadd.xlane.f32.xlu0 %v2519_v7 }
 0x418   : > { %v2521_v10 = vpop.eup %2520 }
 0x419   : > { %v2523_v12 = vpop.eup %2522  ;;  %1820 = vadd.xlane.f32.xlu1 %v2521_v10 }
 0x41a   : > { %v2525_v1 = vpop.eup %2524  ;;  %v1829_v27 = vmul.f32 0.6931472, %v2523_v12 }
 0x41b   : > { %v2527_v0 = vpop.eup %2526  ;;  %1822 = vadd.xlane.f32.xlu0 %v2525_v1 }
 0x41c   : > { %v2529_v30 = vpop.eup %2528  ;;  %v1858_v28 = vsub.f32 %v3857_v18, %v1829_v27  ;;  %v1831_v31 = vmul.f32 0.6931472, %v2527_v0 }
 0x41d   : > { %v1825_v32 = vmul.f32 0.6931472, %v2529_v30 }
 0x41e   : > { %v2531_v33 = vpop.eup %2530  ;;  %1874 = vst [vmem:[%s3930_s25 + $0x10] sm:$0xff] %v1858_v28  ;;  %v1859_v5 = vsub.f32 %v3859_v9, %v1831_v31 }
 0x41f   : > { %v1856_v34 = vsub.f32 %v3862_v19, %v1825_v32  ;;  %v1827_v35 = vmul.f32 0.6931472, %v2531_v33 }
 0x420   : > { %1875 = vst [vmem:[%s3930_s25 + $0x18] sm:$0xff] %v1859_v5 }
 0x421   : > { %1872 = vst [vmem:[%s3930_s25] sm:$0xff] %v1856_v34  ;;  %v1857_v37 = vsub.f32 %v3865_v23, %v1827_v35 }
 0x423   : > { %1873 = vst [vmem:[%s3930_s25 + $0x8] sm:$0xff] %v1857_v37 }
 0x431   : > { %v1805_v18 = vpop.xlane.xlu1 %1804 }
 0x432   : > { %2532 = vlog2.f32 %v1805_v18 }
 0x433   : > { %v1807_v38 = vpop.xlane.xlu0 %1806 }
 0x434   : > { %2534 = vlog2.f32 %v1807_v38 }
 0x435   : > { %v1801_v40 = vpop.xlane.xlu1 %1800 }
 0x436   : > { %2536 = vlog2.f32 %v1801_v40 }
 0x437   : > { %v1803_v41 = vpop.xlane.xlu0 %1802 }
 0x438   : > { %2538 = vlog2.f32 %v1803_v41 }
 0x43c   : > { %v2533_v9 = vpop.eup %2532 }
 0x43d   : > { %v1837_v19 = vmul.f32 0.6931472, %v2533_v9 }
 0x43e   : > { %v2535_v43 = vpop.eup %2534 }
 0x43f   : > { %v1862_v44 = vsub.f32 %v3881_v20, %v1837_v19  ;;  %v1839_v45 = vmul.f32 0.6931472, %v2535_v43 }
 0x440   : > { %v2537_v23 = vpop.eup %2536 }
 0x441   : > { %1878 = vst [vmem:[%s3930_s25 + $0x30] sm:$0xff] %v1862_v44  ;;  %v1863_v46 = vsub.f32 %v3884_v36, %v1839_v45  ;;  %v1833_v47 = vmul.f32 0.6931472, %v2537_v23 }
 0x442   : > { %v2539_v48 = vpop.eup %2538 }
 0x443   : > { %1879 = vst [vmem:[%s3930_s25 + $0x38] sm:$0xff] %v1863_v46  ;;  %v1860_v50 = vsub.f32 %v3887_v39, %v1833_v47  ;;  %v1835_v51 = vmul.f32 0.6931472, %v2539_v48 }
 0x445   : > { %1876 = vst [vmem:[%s3930_s25 + $0x20] sm:$0xff] %v1860_v50  ;;  %v1861_v53 = vsub.f32 %v3891_v42, %v1835_v51 }
 0x447   : > { %1877 = vst [vmem:[%s3930_s25 + $0x28] sm:$0xff] %v1861_v53 }
 0x469   : > { %v1813_v29 = vpop.xlane.xlu1 %1812 }
 0x46a   : > { %2540 = vlog2.f32 %v1813_v29 }
 0x46b   : > { %v1815_v55 = vpop.xlane.xlu0 %1814 }
 0x46c   : > { %2542 = vlog2.f32 %v1815_v55 }
 0x46d   : > { %v1809_v20 = vpop.xlane.xlu1 %1808 }
 0x46e   : > { %2544 = vlog2.f32 %v1809_v20 }
 0x46f   : > { %v1811_v36 = vpop.xlane.xlu0 %1810 }
 0x470   : > { %2546 = vlog2.f32 %v1811_v36 }
 0x474   : > { %v2541_v56 = vpop.eup %2540 }
 0x475   : > { %v1845_v58 = vmul.f32 0.6931472, %v2541_v56 }
 0x476   : > { %v2543_v39 = vpop.eup %2542 }
 0x477   : > { %v1866_v59 = vsub.f32 %v3895_v49, %v1845_v58  ;;  %v1847_v60 = vmul.f32 0.6931472, %v2543_v39 }
 0x478   : > { %v2545_v42 = vpop.eup %2544 }
 0x479   : > { %1882 = vst [vmem:[%s3930_s25 + $0x50] sm:$0xff] %v1866_v59  ;;  %v1867_v61 = vsub.f32 %v3899_v52, %v1847_v60  ;;  %v1841_v62 = vmul.f32 0.6931472, %v2545_v42 }
 0x47a   : > { %v2547_v63 = vpop.eup %2546 }
 0x47b   : > { %1883 = vst [vmem:[%s3930_s25 + $0x58] sm:$0xff] %v1867_v61  ;;  %v1864_v3 = vsub.f32 %v3903_v54, %v1841_v62  ;;  %v1843_v4 = vmul.f32 0.6931472, %v2547_v63 }
 0x47d   : > { %1880 = vst [vmem:[%s3930_s25 + $0x40] sm:$0xff] %v1864_v3  ;;  %v1865_v8 = vsub.f32 %v3907_v57, %v1843_v4 }
 0x47f   : > { %1881 = vst [vmem:[%s3930_s25 + $0x48] sm:$0xff] %v1865_v8 }
 0x4a2   : > { %v1817_v11 = vpop.xlane.xlu1 %1816 }
 0x4a3   : > { %2548 = vlog2.f32 %v1817_v11 }
 0x4a4   : > { %v1819_v49 = vpop.xlane.xlu0 %1818 }
 0x4a5   : > { %2550 = vlog2.f32 %v1819_v49 }
 0x4a6   : > { %v1821_v15 = vpop.xlane.xlu1 %1820 }
 0x4a7   : > { %2552 = vlog2.f32 %v1821_v15 }
 0x4a8   : > { %v1823_v52 = vpop.xlane.xlu0 %1822 }
 0x4a9   : > { %2554 = vlog2.f32 %v1823_v52 }
 0x4ad   : > { %v2549_v16 = vpop.eup %2548 }
 0x4ae   : > { %v1849_v13 = vmul.f32 0.6931472, %v2549_v16 }
 0x4af   : > { %v2551_v54 = vpop.eup %2550 }
 0x4b0   : > { %v1868_v21 = vsub.f32 %v3911_v2, %v1849_v13  ;;  %v1851_v57 = vmul.f32 0.6931472, %v2551_v54 }
 0x4b1   : > { %v2553_v22 = vpop.eup %2552 }
 0x4b2   : > { %1884 = vst [vmem:[%s3930_s25 + $0x60] sm:$0xff] %v1868_v21  ;;  %v1869_v24 = vsub.f32 %v3915_v6, %v1851_v57  ;;  %v1853_v25 = vmul.f32 0.6931472, %v2553_v22 }
 0x4b3   : > { %v2555_v26 = vpop.eup %2554 }
 0x4b4   : > { %1885 = vst [vmem:[%s3930_s25 + $0x68] sm:$0xff] %v1869_v24  ;;  %v1870_v7 = vsub.f32 %v3919_v14, %v1853_v25  ;;  %v1855_v10 = vmul.f32 0.6931472, %v2555_v26 }
 0x4b6   : > { %1886 = vst [vmem:[%s3930_s25 + $0x70] sm:$0xff] %v1870_v7  ;;  %v1871_v2 = vsub.f32 %v3923_v17, %v1855_v10 }
 0x4b8   : > { %1887 = vst [vmem:[%s3930_s25 + $0x78] sm:$0xff] %v1871_v2 }
 0x4b9   : > { %2597 = shalt.err (!%p2594_p7)
}
 0x4ba   : > { %s2598_s9 = scalar_lea.hbm %s3965_s30, 2048  ;;  %s2602_s16 = scalar_lea.hbm %s4020_s5, 4096 }
 0x4bb   : > { %p2599_p8 = scmp.ne.s32.totalorder %s3965_s30, %s2598_s9  ;;  %p2603_p1 = scmp.lt.u32.totalorder %s3965_s30, %s4020_s5 }
 0x4bc   : > { %p2604_p0 = scmp.lt.u32.totalorder %s2602_s16, %s2598_s9  ;;  %p2606_p6 = scmp.lt.u32.totalorder %s2598_s9, %s3965_s30 }
 0x4bd   : > { %p2600_p11 = pnand %p2599_p8, %p4079_p9 }
 0x4be   : > { %p2605_p5 = por %p2604_p0, %p2603_p1 }
 0x4bf   : > { %p2601_p13 = pneg %p2600_p11 }
 0x4c0   : > { %p2607_p10 = por %p2606_p6, %p2605_p5 }
 0x4c2   : > { %p2608_p12 = pnand %p2607_p10, %p2601_p13 }
 0x4c4   : > { %2611 = shalt.err (!%p2608_p12)
}
 0x4c5   : > { %s2661_s25 = smov 128   ;;  %s2662_s26 = smov 8  }
 0x4c6   : > { %2357 = dma.vmem_to_hbm [thread:$0]  (%p4079_p9), %s3967_s6, 2048, %s3965_s30, %s3974_s22, %s2661_s25, %s2661_s25, %s2662_s26  }
 0x4c7 PF: > { %p2369_p2 = scmp.ge.s32.totalorder %s2650_s21, 2  ;;  %s1917_s7 = sand.u32 1, %s2638_s18  }
 0x4c8   : > { %p4080_p3 = scmp.ne.s32.totalorder %s4025_s29, 0  ;;  %s1918_s8 = scalar_lea.sflag [#allocation4], %s1917_s7 }
 0x4ca   : > { %p2364_p4 = pnand %p2369_p2, %p4080_p3 }
 0x4cc   : > { %2633 = dma.done.wait (!%p2364_p4), %s1918_s8, 2048  }
 0x4cd   : > { %2635 = vsyncadd (!%p2364_p4), %s1918_s8, 4294965248  ;;  %p16_p7 = scmp.ge.s32.totalorder %s2718_s24, 4   ;;  %s4081_s18 = smov %s2642_s19 }
 0x4ce   : > { %s4082_s19 = smov %s2646_s20  ;;  %s4083_s20 = smov %s2729_s27 }
 0x4cf   : > { %s4084_s21 = smov %s2718_s24  ;;  %18 = sbr.rel (!%p16_p7) target bundleno = 4 (0x4), region = 80 }
 0x4d6   :  { %1923 = vsyncpa [#allocation3], 1 }
 0x4d7   :  { %1925 = vsyncpa [#allocation3 + $0x1], 1 }
 0x4d8   :  { %1926 = vsyncpa [#allocation4], 1 }
 0x4d9   :  { %1928 = vsyncpa [#allocation4 + $0x1], 1 }

</bundles_post_ra>
